<compile_context>
chip_gen: v5e
topology: v5e:2x2
jax: 0.10.0
libtpu: 0.0.40
codegen_flags: <defaults>
</compile_context>

<pallas_src>
import functools
import math

import jax
import jax.numpy as jnp
from jax import lax
from jax.experimental import pallas as pl
from jax.experimental.pallas import tpu as pltpu


def _layer_norm(x, gamma, beta, eps):
    """PyTorch-style LayerNorm: unbiased std, eps added to std."""
    d = x.shape[-1]
    mean = jnp.mean(x, axis=-1, keepdims=True)
    c = x - mean
    var = jnp.sum(c * c, axis=-1, keepdims=True) * (1.0 / (d - 1))
    inv = pl.reciprocal(jnp.sqrt(var) + eps, approx=True)
    return gamma * (c * inv) + beta


def _encoder_layer_kernel(
    x_ref, mask_ref,
    wqkv_ref, bqkv_ref, wo_ref, w1_ref, b1_ref, w2_ref, vecs_ref,
    o_ref,
    *, num_heads: int, eps: float, s_pad: int,
):
    Bt, S, D = x_ref.shape
    Sp = S + 1
    d_k = D // num_heads
    M = Bt * s_pad

    vecs = vecs_ref[...]                          # (6, D) f32
    gamma1, beta1 = vecs[0:1, :], vecs[1:2, :]
    gamma2, beta2 = vecs[2:3, :], vecs[3:4, :]
    bo, b2 = vecs[4:5, :], vecs[5:6, :]

    # cls token = mean over the sequence, prepended; zero-pad rows to s_pad.
    x = x_ref[...]                                # (Bt, S, D) f32
    cls = jnp.mean(x, axis=1, keepdims=True)      # (Bt, 1, D)
    if s_pad > Sp:
        pad = jnp.zeros((Bt, s_pad - Sp, D), jnp.float32)
        xc3 = jnp.concatenate([cls, x, pad], axis=1)
    else:
        xc3 = jnp.concatenate([cls, x], axis=1)
    xc = xc3.reshape(M, D)                        # (M, D) slab

    # ---------------- sublayer 0: xc + self_attn(LN1(xc), mask) ------------ #
    n1 = _layer_norm(xc, gamma1, beta1, eps)
    qkv = jnp.dot(n1.astype(jnp.bfloat16), wqkv_ref[...],
                  preferred_element_type=jnp.float32) + bqkv_ref[...]   # (M, 3D)

    scale = jnp.float32(1.0 / math.sqrt(d_k))
    neg = jnp.float32(-1e9)
    mask_all = mask_ref[...]                      # (Bt, 1, Sp)

    ctx_rows = []
    for b in range(Bt):
        r0 = b * s_pad
        qb = qkv[r0:r0 + s_pad, 0:D]
        kb = qkv[r0:r0 + s_pad, D:2 * D]
        vb = qkv[r0:r0 + s_pad, 2 * D:3 * D]

        # Key-mask bias computed once per element (hoisted out of head loop);
        # padded key columns are always masked out.
        bias = jnp.where(mask_all[b] == 0.0, neg, jnp.float32(0.0))     # (1, Sp)
        if s_pad > Sp:
            bias = jnp.concatenate(
                [bias, jnp.full((1, s_pad - Sp), neg, jnp.float32)], axis=1)

        heads = []
        for h in range(num_heads):
            c0 = h * d_k
            qh = qb[:, c0:c0 + d_k].astype(jnp.bfloat16)
            kh = kb[:, c0:c0 + d_k].astype(jnp.bfloat16)
            vh = vb[:, c0:c0 + d_k].astype(jnp.bfloat16)
            scores = lax.dot_general(
                qh, kh, (((1,), (1,)), ((), ())),
                preferred_element_type=jnp.float32) * scale + bias      # (s_pad, s_pad)
            scores = scores - jnp.max(scores, axis=-1, keepdims=True)
            p = jnp.exp(scores)
            p = p * pl.reciprocal(jnp.sum(p, axis=-1, keepdims=True), approx=True)
            heads.append(jnp.dot(p.astype(jnp.bfloat16), vh,
                                 preferred_element_type=jnp.float32))   # (s_pad, d_k)
        ctx_rows.append(jnp.concatenate(heads, axis=1))                 # (s_pad, D)

    ctx = jnp.concatenate(ctx_rows, axis=0)                             # (M, D)
    attn_out = jnp.dot(ctx.astype(jnp.bfloat16), wo_ref[...],
                       preferred_element_type=jnp.float32) + bo
    y = xc + attn_out                             # residual (dropout = identity)

    # ---------------------- sublayer 1: y + FFN(LN2(y)) -------------------- #
    n2 = _layer_norm(y, gamma2, beta2, eps)
    hdn = jnp.dot(n2.astype(jnp.bfloat16), w1_ref[...],
                  preferred_element_type=jnp.float32) + b1_ref[...]
    hdn = jnp.maximum(hdn, 0.0)
    ff = jnp.dot(hdn.astype(jnp.bfloat16), w2_ref[...],
                 preferred_element_type=jnp.float32) + b2

    res = y + ff                                  # (M, D)
    for b in range(Bt):                           # write back only the real Sp rows
        r0 = b * s_pad
        o_ref[b] = res[r0:r0 + Sp, :].astype(o_ref.dtype)


def encoder_layer_forward(x, mask, params, *, num_heads, eps=1e-6, b_tile=None):
    """x: (B, S, D) f32; mask: (B, 1, S+1) f32 (1 = attend, 0 = masked)."""
    B, S, D = x.shape
    Sp = S + 1
    s_pad = ((Sp + 7) // 8) * 8
    d_ff = params["w1"].shape[1]

    if b_tile is None:
        # Keep >= 2 grid steps so both v7x TensorCores get work; whole batch
        # otherwise (v5e/v6e have a single TC per chip).
        b_tile = B // 2 if (B >= 2 and B % 2 == 0) else B
    assert B % b_tile == 0
    grid = (B // b_tile,)

    # Operand packing: fused QKV, bf16 weights, stacked (1, D) vectors.
    wqkv = jnp.concatenate([params["wq"], params["wk"], params["wv"]],
                           axis=1).astype(jnp.bfloat16)                 # (D, 3D)
    bqkv = jnp.concatenate([params["bq"], params["bk"], params["bv"]], axis=1)
    wo = params["wo"].astype(jnp.bfloat16)
    w1 = params["w1"].astype(jnp.bfloat16)
    w2 = params["w2"].astype(jnp.bfloat16)
    b1 = params["b1"]
    vecs = jnp.concatenate([params["gamma1"], params["beta1"],
                            params["gamma2"], params["beta2"],
                            params["bo"], params["b2"]], axis=0)        # (6, D)

    kernel = functools.partial(_encoder_layer_kernel, num_heads=num_heads,
                               eps=float(eps), s_pad=s_pad)

    batch_map = lambda b: (b, 0, 0)
    const2 = lambda b: (0, 0)

    in_specs = [
        pl.BlockSpec((b_tile, S, D), batch_map),     # x
        pl.BlockSpec((b_tile, 1, Sp), batch_map),    # mask
        pl.BlockSpec((D, 3 * D), const2),            # wqkv (bf16)
        pl.BlockSpec((1, 3 * D), const2),            # bqkv
        pl.BlockSpec((D, D), const2),                # wo (bf16)
        pl.BlockSpec((D, d_ff), const2),             # w1 (bf16)
        pl.BlockSpec((1, d_ff), const2),             # b1
        pl.BlockSpec((d_ff, D), const2),             # w2 (bf16)
        pl.BlockSpec((6, D), const2),                # gamma1,beta1,gamma2,beta2,bo,b2
    ]
    out_spec = pl.BlockSpec((b_tile, Sp, D), batch_map)

    d_k = D // num_heads
    flops = int(B * (2 * s_pad * D * 3 * D                      # fused QKV
                     + num_heads * 2 * 2 * s_pad * s_pad * d_k  # qk^T and pv
                     + 2 * s_pad * D * D                        # Wo
                     + 2 * 2 * s_pad * D * d_ff))               # FFN
    bytes_accessed = int(
        4 * (x.size + mask.size + B * Sp * D + bqkv.size + b1.size + vecs.size)
        + 2 * (wqkv.size + wo.size + w1.size + w2.size))
    cost = pl.CostEstimate(flops=flops,
                           transcendentals=int(B * num_heads * s_pad * s_pad),
                           bytes_accessed=bytes_accessed)

    return pl.pallas_call(
        kernel,
        out_shape=jax.ShapeDtypeStruct((B, Sp, D), x.dtype),
        grid=grid,
        in_specs=in_specs,
        out_specs=out_spec,
        compiler_params=pltpu.CompilerParams(dimension_semantics=("parallel",)),
        cost_estimate=cost,
    )(x, mask, wqkv, bqkv, wo, w1, b1, w2, vecs)


# --------------------------- plain-JAX reference --------------------------- #

def reference_forward(x, mask, params, *, num_heads, eps=1e-6):
    B, S, D = x.shape
    d_k = D // num_heads
    Sp = S + 1

    cls = jnp.mean(x, axis=1, keepdims=True)
    xc = jnp.concatenate([cls, x], axis=1)                  # (B, Sp, D)

    def ln(t, g, b):
        m = jnp.mean(t, axis=-1, keepdims=True)
        var = jnp.sum((t - m) ** 2, axis=-1, keepdims=True) / (D - 1)
        return g * (t - m) / (jnp.sqrt(var) + eps) + b

    n1 = ln(xc, params["gamma1"], params["beta1"])
    q = n1 @ params["wq"] + params["bq"]
    k = n1 @ params["wk"] + params["bk"]
    v = n1 @ params["wv"] + params["bv"]

    def split(t):
        return t.reshape(B, Sp, num_heads, d_k).transpose(0, 2, 1, 3)

    qh, kh, vh = split(q), split(k), split(v)
    scores = jnp.einsum("bhqd,bhkd->bhqk", qh, kh) / math.sqrt(d_k)
    scores = jnp.where(mask[:, None, :, :] == 0.0, -1e9, scores)
    p = jax.nn.softmax(scores, axis=-1)
    o = jnp.einsum("bhqk,bhkd->bhqd", p, vh)
    o = o.transpose(0, 2, 1, 3).reshape(B, Sp, D)
    y = xc + (o @ params["wo"] + params["bo"])

    n2 = ln(y, params["gamma2"], params["beta2"])
    h = jnp.maximum(n2 @ params["w1"] + params["b1"], 0.0)
    return y + (h @ params["w2"] + params["b2"])


# --------------------------------- main ------------------------------------ #

if __name__ == "__main__":
    B, S, D = 4, 8, 128          # batch=4, seq=8, d_model=128 (lane-dense)
    H, D_FF = 4, 256

    keys = jax.random.split(jax.random.PRNGKey(0), 13)
    scale = 0.05
    params = {
        "gamma1": jnp.ones((1, D), jnp.float32),
        "beta1":  jnp.zeros((1, D), jnp.float32),
        "wq": scale * jax.random.normal(keys[0], (D, D), jnp.float32),
        "bq": scale * jax.random.normal(keys[1], (1, D), jnp.float32),
        "wk": scale * jax.random.normal(keys[2], (D, D), jnp.float32),
        "bk": scale * jax.random.normal(keys[3], (1, D), jnp.float32),
        "wv": scale * jax.random.normal(keys[4], (D, D), jnp.float32),
        "bv": scale * jax.random.normal(keys[5], (1, D), jnp.float32),
        "wo": scale * jax.random.normal(keys[6], (D, D), jnp.float32),
        "bo": scale * jax.random.normal(keys[7], (1, D), jnp.float32),
        "gamma2": jnp.ones((1, D), jnp.float32),
        "beta2":  jnp.zeros((1, D), jnp.float32),
        "w1": scale * jax.random.normal(keys[8], (D, D_FF), jnp.float32),
        "b1": scale * jax.random.normal(keys[9], (1, D_FF), jnp.float32),
        "w2": scale * jax.random.normal(keys[10], (D_FF, D), jnp.float32),
        "b2": scale * jax.random.normal(keys[11], (1, D), jnp.float32),
    }

    x = jax.random.normal(keys[12], (B, S, D), jnp.float32)
    mask = jnp.ones((B, 1, S + 1), jnp.float32)   # padding mask over keys (incl. cls)

    out = encoder_layer_forward(x, mask, params, num_heads=H)
    out = jax.block_until_ready(out)

    ref = reference_forward(x, mask, params, num_heads=H)
    assert out.shape == (B, S + 1, D)
    err = float(jnp.max(jnp.abs(out - ref)))
    assert jnp.allclose(out, ref, atol=3e-2, rtol=3e-2), f"max abs err {err}"

    print("KERNEL_OK")
</pallas_src>

<mosaic_0001>
module attributes {stable_mosaic.version = 11 : i64} {
  func.func @_encoder_layer_kernel(%arg0: i32, %arg1: memref<2x8x128xf32, #tpu.memory_space<vmem>>, %arg2: memref<2x1x9xf32, #tpu.memory_space<vmem>>, %arg3: memref<128x384xbf16, #tpu.memory_space<vmem>>, %arg4: memref<1x384xf32, #tpu.memory_space<vmem>>, %arg5: memref<128x128xbf16, #tpu.memory_space<vmem>>, %arg6: memref<128x256xbf16, #tpu.memory_space<vmem>>, %arg7: memref<1x256xf32, #tpu.memory_space<vmem>>, %arg8: memref<256x128xbf16, #tpu.memory_space<vmem>>, %arg9: memref<6x128xf32, #tpu.memory_space<vmem>>, %arg10: memref<2x9x128xf32, #tpu.memory_space<vmem>>) attributes {dimension_semantics = [#tpu.dimension_semantics<parallel>], iteration_bounds = array<i64: 2>, scalar_prefetch = 0 : i64, scratch_operands = 0 : i64, tpu.core_type = #tpu.core_type<tc>, window_params = [{transform_indices = @transform_0, window_bounds = array<i64: 2, 8, 128>}, {transform_indices = @transform_1, window_bounds = array<i64: 2, 1, 9>}, {pipeline_mode = #tpu.pipeline_mode<synchronous>, transform_indices = @transform_2, window_bounds = array<i64: 128, 384>}, {pipeline_mode = #tpu.pipeline_mode<synchronous>, transform_indices = @transform_3, window_bounds = array<i64: 1, 384>}, {pipeline_mode = #tpu.pipeline_mode<synchronous>, transform_indices = @transform_4, window_bounds = array<i64: 128, 128>}, {pipeline_mode = #tpu.pipeline_mode<synchronous>, transform_indices = @transform_5, window_bounds = array<i64: 128, 256>}, {pipeline_mode = #tpu.pipeline_mode<synchronous>, transform_indices = @transform_6, window_bounds = array<i64: 1, 256>}, {pipeline_mode = #tpu.pipeline_mode<synchronous>, transform_indices = @transform_7, window_bounds = array<i64: 256, 128>}, {pipeline_mode = #tpu.pipeline_mode<synchronous>, transform_indices = @transform_8, window_bounds = array<i64: 6, 128>}, {transform_indices = @transform_9, window_bounds = array<i64: 2, 9, 128>}]} {
    %c0 = arith.constant 0 : index
    %c0_0 = arith.constant 0 : index
    %0 = vector.load %arg9[%c0, %c0_0] : memref<6x128xf32, #tpu.memory_space<vmem>>, vector<6x128xf32>
    %1 = vector.extract_strided_slice %0 {offsets = [0, 0], sizes = [1, 128], strides = [1, 1]} : vector<6x128xf32> to vector<1x128xf32>
    %2 = vector.extract_strided_slice %0 {offsets = [1, 0], sizes = [1, 128], strides = [1, 1]} : vector<6x128xf32> to vector<1x128xf32>
    %3 = vector.extract_strided_slice %0 {offsets = [2, 0], sizes = [1, 128], strides = [1, 1]} : vector<6x128xf32> to vector<1x128xf32>
    %4 = vector.extract_strided_slice %0 {offsets = [3, 0], sizes = [1, 128], strides = [1, 1]} : vector<6x128xf32> to vector<1x128xf32>
    %5 = vector.extract_strided_slice %0 {offsets = [4, 0], sizes = [1, 128], strides = [1, 1]} : vector<6x128xf32> to vector<1x128xf32>
    %6 = vector.extract_strided_slice %0 {offsets = [5, 0], sizes = [1, 128], strides = [1, 1]} : vector<6x128xf32> to vector<1x128xf32>
    %c0_1 = arith.constant 0 : index
    %c0_2 = arith.constant 0 : index
    %c0_3 = arith.constant 0 : index
    %7 = vector.load %arg1[%c0_1, %c0_2, %c0_3] : memref<2x8x128xf32, #tpu.memory_space<vmem>>, vector<2x8x128xf32>
    %cst = arith.constant dense<0.000000e+00> : vector<2x128xf32>
    %8 = vector.multi_reduction <add>, %7, %cst [1] : vector<2x8x128xf32> to vector<2x128xf32>
    %9 = vector.shape_cast %8 : vector<2x128xf32> to vector<2x1x128xf32>
    %cst_4 = arith.constant 8.000000e+00 : f32
    %10 = vector.broadcast %cst_4 : f32 to vector<2x1x128xf32>
    %11 = arith.divf %9, %10 : vector<2x1x128xf32>
    %cst_5 = arith.constant 0.000000e+00 : f32
    %12 = vector.broadcast %cst_5 : f32 to vector<2x7x128xf32>
    %13 = tpu.concatenate %11, %7, %12 in 1 : vector<2x1x128xf32>, vector<2x8x128xf32>, vector<2x7x128xf32> -> vector<2x16x128xf32>
    %14 = vector.shape_cast %13 : vector<2x16x128xf32> to vector<32x128xf32>
    %cst_6 = arith.constant dense<0.000000e+00> : vector<32xf32>
    %15 = vector.multi_reduction <add>, %14, %cst_6 [1] : vector<32x128xf32> to vector<32xf32>
    %16 = vector.shape_cast %15 : vector<32xf32> to vector<32x1xf32>
    %cst_7 = arith.constant 1.280000e+02 : f32
    %17 = vector.broadcast %cst_7 : f32 to vector<32x1xf32>
    %18 = arith.divf %16, %17 : vector<32x1xf32>
    %19 = vector.broadcast %18 : vector<32x1xf32> to vector<32x128xf32>
    %20 = arith.subf %14, %19 : vector<32x128xf32>
    %21 = arith.mulf %20, %20 : vector<32x128xf32>
    %cst_8 = arith.constant dense<0.000000e+00> : vector<32xf32>
    %22 = vector.multi_reduction <add>, %21, %cst_8 [1] : vector<32x128xf32> to vector<32xf32>
    %23 = vector.shape_cast %22 : vector<32xf32> to vector<32x1xf32>
    %cst_9 = arith.constant 0.00787401571 : f32
    %24 = vector.broadcast %cst_9 : f32 to vector<32x1xf32>
    %25 = arith.mulf %23, %24 : vector<32x1xf32>
    %26 = math.sqrt %25 : vector<32x1xf32>
    %cst_10 = arith.constant 9.99999997E-7 : f32
    %27 = vector.broadcast %cst_10 : f32 to vector<32x1xf32>
    %28 = arith.addf %26, %27 : vector<32x1xf32>
    %29 = tpu.reciprocal %28 {approx = true} : vector<32x1xf32> -> vector<32x1xf32>
    %30 = vector.broadcast %29 : vector<32x1xf32> to vector<32x128xf32>
    %31 = arith.mulf %20, %30 : vector<32x128xf32>
    %32 = vector.broadcast %1 : vector<1x128xf32> to vector<32x128xf32>
    %33 = arith.mulf %32, %31 : vector<32x128xf32>
    %34 = vector.broadcast %2 : vector<1x128xf32> to vector<32x128xf32>
    %35 = arith.addf %33, %34 : vector<32x128xf32>
    %36 = arith.truncf %35 : vector<32x128xf32> to vector<32x128xbf16>
    %c0_11 = arith.constant 0 : index
    %c0_12 = arith.constant 0 : index
    %37 = vector.load %arg3[%c0_11, %c0_12] : memref<128x384xbf16, #tpu.memory_space<vmem>>, vector<128x384xbf16>
    %cst_13 = arith.constant dense<0.000000e+00> : vector<32x384xf32>
    %38 = tpu.matmul %36, %37, %cst_13 {dimension_numbers = #tpu.dot_dimension_numbers<[1], [0], [0], [1], [0, 0, 1, 1], [], []>} : vector<32x128xbf16>, vector<128x384xbf16>, vector<32x384xf32> -> vector<32x384xf32>
    %c0_14 = arith.constant 0 : index
    %c0_15 = arith.constant 0 : index
    %39 = vector.load %arg4[%c0_14, %c0_15] : memref<1x384xf32, #tpu.memory_space<vmem>>, vector<1x384xf32>
    %40 = vector.broadcast %39 : vector<1x384xf32> to vector<32x384xf32>
    %41 = arith.addf %38, %40 : vector<32x384xf32>
    %c0_16 = arith.constant 0 : index
    %c0_17 = arith.constant 0 : index
    %c0_18 = arith.constant 0 : index
    %42 = vector.load %arg2[%c0_16, %c0_17, %c0_18] : memref<2x1x9xf32, #tpu.memory_space<vmem>>, vector<2x1x9xf32>
    %43 = vector.extract_strided_slice %41 {offsets = [0, 0], sizes = [16, 128], strides = [1, 1]} : vector<32x384xf32> to vector<16x128xf32>
    %44 = vector.extract_strided_slice %41 {offsets = [0, 128], sizes = [16, 128], strides = [1, 1]} : vector<32x384xf32> to vector<16x128xf32>
    %45 = vector.extract_strided_slice %41 {offsets = [0, 256], sizes = [16, 128], strides = [1, 1]} : vector<32x384xf32> to vector<16x128xf32>
    %46 = vector.extract_strided_slice %42 {offsets = [0, 0, 0], sizes = [1, 1, 9], strides = [1, 1, 1]} : vector<2x1x9xf32> to vector<1x1x9xf32>
    %47 = vector.shape_cast %46 : vector<1x1x9xf32> to vector<1x9xf32>
    %cst_19 = arith.constant 0.000000e+00 : f32
    %48 = vector.broadcast %cst_19 : f32 to vector<1x9xf32>
    %49 = arith.cmpf oeq, %47, %48 : vector<1x9xf32>
    %cst_20 = arith.constant -1.000000e+09 : f32
    %cst_21 = arith.constant 0.000000e+00 : f32
    %50 = vector.broadcast %cst_20 : f32 to vector<1x9xf32>
    %51 = vector.broadcast %cst_21 : f32 to vector<1x9xf32>
    %52 = arith.select %49, %50, %51 : vector<1x9xi1>, vector<1x9xf32>
    %cst_22 = arith.constant -1.000000e+09 : f32
    %53 = vector.broadcast %cst_22 : f32 to vector<1x7xf32>
    %54 = tpu.concatenate %52, %53 in 1 : vector<1x9xf32>, vector<1x7xf32> -> vector<1x16xf32>
    %55 = vector.extract_strided_slice %43 {offsets = [0, 0], sizes = [16, 32], strides = [1, 1]} : vector<16x128xf32> to vector<16x32xf32>
    %56 = arith.truncf %55 : vector<16x32xf32> to vector<16x32xbf16>
    %57 = vector.extract_strided_slice %44 {offsets = [0, 0], sizes = [16, 32], strides = [1, 1]} : vector<16x128xf32> to vector<16x32xf32>
    %58 = arith.truncf %57 : vector<16x32xf32> to vector<16x32xbf16>
    %59 = vector.extract_strided_slice %45 {offsets = [0, 0], sizes = [16, 32], strides = [1, 1]} : vector<16x128xf32> to vector<16x32xf32>
    %60 = arith.truncf %59 : vector<16x32xf32> to vector<16x32xbf16>
    %cst_23 = arith.constant dense<0.000000e+00> : vector<16x16xf32>
    %61 = tpu.matmul %56, %58, %cst_23 {dimension_numbers = #tpu.dot_dimension_numbers<[1], [1], [0], [0], [0, 0, 1, 0], [], []>} : vector<16x32xbf16>, vector<16x32xbf16>, vector<16x16xf32> -> vector<16x16xf32>
    %cst_24 = arith.constant 0.176776692 : f32
    %62 = vector.broadcast %cst_24 : f32 to vector<16x16xf32>
    %63 = arith.mulf %61, %62 : vector<16x16xf32>
    %64 = vector.broadcast %54 : vector<1x16xf32> to vector<16x16xf32>
    %65 = arith.addf %63, %64 : vector<16x16xf32>
    %cst_25 = arith.constant dense<0xFF800000> : vector<16xf32>
    %66 = vector.multi_reduction <maximumf>, %65, %cst_25 [1] : vector<16x16xf32> to vector<16xf32>
    %67 = vector.shape_cast %66 : vector<16xf32> to vector<16x1xf32>
    %68 = vector.broadcast %67 : vector<16x1xf32> to vector<16x16xf32>
    %69 = arith.subf %65, %68 : vector<16x16xf32>
    %70 = math.exp %69 : vector<16x16xf32>
    %cst_26 = arith.constant dense<0.000000e+00> : vector<16xf32>
    %71 = vector.multi_reduction <add>, %70, %cst_26 [1] : vector<16x16xf32> to vector<16xf32>
    %72 = vector.shape_cast %71 : vector<16xf32> to vector<16x1xf32>
    %73 = tpu.reciprocal %72 {approx = true} : vector<16x1xf32> -> vector<16x1xf32>
    %74 = vector.broadcast %73 : vector<16x1xf32> to vector<16x16xf32>
    %75 = arith.mulf %70, %74 : vector<16x16xf32>
    %76 = arith.truncf %75 : vector<16x16xf32> to vector<16x16xbf16>
    %cst_27 = arith.constant dense<0.000000e+00> : vector<16x32xf32>
    %77 = tpu.matmul %76, %60, %cst_27 {dimension_numbers = #tpu.dot_dimension_numbers<[1], [0], [0], [1], [0, 0, 1, 1], [], []>} : vector<16x16xbf16>, vector<16x32xbf16>, vector<16x32xf32> -> vector<16x32xf32>
    %78 = vector.extract_strided_slice %43 {offsets = [0, 32], sizes = [16, 32], strides = [1, 1]} : vector<16x128xf32> to vector<16x32xf32>
    %79 = arith.truncf %78 : vector<16x32xf32> to vector<16x32xbf16>
    %80 = vector.extract_strided_slice %44 {offsets = [0, 32], sizes = [16, 32], strides = [1, 1]} : vector<16x128xf32> to vector<16x32xf32>
    %81 = arith.truncf %80 : vector<16x32xf32> to vector<16x32xbf16>
    %82 = vector.extract_strided_slice %45 {offsets = [0, 32], sizes = [16, 32], strides = [1, 1]} : vector<16x128xf32> to vector<16x32xf32>
    %83 = arith.truncf %82 : vector<16x32xf32> to vector<16x32xbf16>
    %cst_28 = arith.constant dense<0.000000e+00> : vector<16x16xf32>
    %84 = tpu.matmul %79, %81, %cst_28 {dimension_numbers = #tpu.dot_dimension_numbers<[1], [1], [0], [0], [0, 0, 1, 0], [], []>} : vector<16x32xbf16>, vector<16x32xbf16>, vector<16x16xf32> -> vector<16x16xf32>
    %cst_29 = arith.constant 0.176776692 : f32
    %85 = vector.broadcast %cst_29 : f32 to vector<16x16xf32>
    %86 = arith.mulf %84, %85 : vector<16x16xf32>
    %87 = vector.broadcast %54 : vector<1x16xf32> to vector<16x16xf32>
    %88 = arith.addf %86, %87 : vector<16x16xf32>
    %cst_30 = arith.constant dense<0xFF800000> : vector<16xf32>
    %89 = vector.multi_reduction <maximumf>, %88, %cst_30 [1] : vector<16x16xf32> to vector<16xf32>
    %90 = vector.shape_cast %89 : vector<16xf32> to vector<16x1xf32>
    %91 = vector.broadcast %90 : vector<16x1xf32> to vector<16x16xf32>
    %92 = arith.subf %88, %91 : vector<16x16xf32>
    %93 = math.exp %92 : vector<16x16xf32>
    %cst_31 = arith.constant dense<0.000000e+00> : vector<16xf32>
    %94 = vector.multi_reduction <add>, %93, %cst_31 [1] : vector<16x16xf32> to vector<16xf32>
    %95 = vector.shape_cast %94 : vector<16xf32> to vector<16x1xf32>
    %96 = tpu.reciprocal %95 {approx = true} : vector<16x1xf32> -> vector<16x1xf32>
    %97 = vector.broadcast %96 : vector<16x1xf32> to vector<16x16xf32>
    %98 = arith.mulf %93, %97 : vector<16x16xf32>
    %99 = arith.truncf %98 : vector<16x16xf32> to vector<16x16xbf16>
    %cst_32 = arith.constant dense<0.000000e+00> : vector<16x32xf32>
    %100 = tpu.matmul %99, %83, %cst_32 {dimension_numbers = #tpu.dot_dimension_numbers<[1], [0], [0], [1], [0, 0, 1, 1], [], []>} : vector<16x16xbf16>, vector<16x32xbf16>, vector<16x32xf32> -> vector<16x32xf32>
    %101 = vector.extract_strided_slice %43 {offsets = [0, 64], sizes = [16, 32], strides = [1, 1]} : vector<16x128xf32> to vector<16x32xf32>
    %102 = arith.truncf %101 : vector<16x32xf32> to vector<16x32xbf16>
    %103 = vector.extract_strided_slice %44 {offsets = [0, 64], sizes = [16, 32], strides = [1, 1]} : vector<16x128xf32> to vector<16x32xf32>
    %104 = arith.truncf %103 : vector<16x32xf32> to vector<16x32xbf16>
    %105 = vector.extract_strided_slice %45 {offsets = [0, 64], sizes = [16, 32], strides = [1, 1]} : vector<16x128xf32> to vector<16x32xf32>
    %106 = arith.truncf %105 : vector<16x32xf32> to vector<16x32xbf16>
    %cst_33 = arith.constant dense<0.000000e+00> : vector<16x16xf32>
    %107 = tpu.matmul %102, %104, %cst_33 {dimension_numbers = #tpu.dot_dimension_numbers<[1], [1], [0], [0], [0, 0, 1, 0], [], []>} : vector<16x32xbf16>, vector<16x32xbf16>, vector<16x16xf32> -> vector<16x16xf32>
    %cst_34 = arith.constant 0.176776692 : f32
    %108 = vector.broadcast %cst_34 : f32 to vector<16x16xf32>
    %109 = arith.mulf %107, %108 : vector<16x16xf32>
    %110 = vector.broadcast %54 : vector<1x16xf32> to vector<16x16xf32>
    %111 = arith.addf %109, %110 : vector<16x16xf32>
    %cst_35 = arith.constant dense<0xFF800000> : vector<16xf32>
    %112 = vector.multi_reduction <maximumf>, %111, %cst_35 [1] : vector<16x16xf32> to vector<16xf32>
    %113 = vector.shape_cast %112 : vector<16xf32> to vector<16x1xf32>
    %114 = vector.broadcast %113 : vector<16x1xf32> to vector<16x16xf32>
    %115 = arith.subf %111, %114 : vector<16x16xf32>
    %116 = math.exp %115 : vector<16x16xf32>
    %cst_36 = arith.constant dense<0.000000e+00> : vector<16xf32>
    %117 = vector.multi_reduction <add>, %116, %cst_36 [1] : vector<16x16xf32> to vector<16xf32>
    %118 = vector.shape_cast %117 : vector<16xf32> to vector<16x1xf32>
    %119 = tpu.reciprocal %118 {approx = true} : vector<16x1xf32> -> vector<16x1xf32>
    %120 = vector.broadcast %119 : vector<16x1xf32> to vector<16x16xf32>
    %121 = arith.mulf %116, %120 : vector<16x16xf32>
    %122 = arith.truncf %121 : vector<16x16xf32> to vector<16x16xbf16>
    %cst_37 = arith.constant dense<0.000000e+00> : vector<16x32xf32>
    %123 = tpu.matmul %122, %106, %cst_37 {dimension_numbers = #tpu.dot_dimension_numbers<[1], [0], [0], [1], [0, 0, 1, 1], [], []>} : vector<16x16xbf16>, vector<16x32xbf16>, vector<16x32xf32> -> vector<16x32xf32>
    %124 = vector.extract_strided_slice %43 {offsets = [0, 96], sizes = [16, 32], strides = [1, 1]} : vector<16x128xf32> to vector<16x32xf32>
    %125 = arith.truncf %124 : vector<16x32xf32> to vector<16x32xbf16>
    %126 = vector.extract_strided_slice %44 {offsets = [0, 96], sizes = [16, 32], strides = [1, 1]} : vector<16x128xf32> to vector<16x32xf32>
    %127 = arith.truncf %126 : vector<16x32xf32> to vector<16x32xbf16>
    %128 = vector.extract_strided_slice %45 {offsets = [0, 96], sizes = [16, 32], strides = [1, 1]} : vector<16x128xf32> to vector<16x32xf32>
    %129 = arith.truncf %128 : vector<16x32xf32> to vector<16x32xbf16>
    %cst_38 = arith.constant dense<0.000000e+00> : vector<16x16xf32>
    %130 = tpu.matmul %125, %127, %cst_38 {dimension_numbers = #tpu.dot_dimension_numbers<[1], [1], [0], [0], [0, 0, 1, 0], [], []>} : vector<16x32xbf16>, vector<16x32xbf16>, vector<16x16xf32> -> vector<16x16xf32>
    %cst_39 = arith.constant 0.176776692 : f32
    %131 = vector.broadcast %cst_39 : f32 to vector<16x16xf32>
    %132 = arith.mulf %130, %131 : vector<16x16xf32>
    %133 = vector.broadcast %54 : vector<1x16xf32> to vector<16x16xf32>
    %134 = arith.addf %132, %133 : vector<16x16xf32>
    %cst_40 = arith.constant dense<0xFF800000> : vector<16xf32>
    %135 = vector.multi_reduction <maximumf>, %134, %cst_40 [1] : vector<16x16xf32> to vector<16xf32>
    %136 = vector.shape_cast %135 : vector<16xf32> to vector<16x1xf32>
    %137 = vector.broadcast %136 : vector<16x1xf32> to vector<16x16xf32>
    %138 = arith.subf %134, %137 : vector<16x16xf32>
    %139 = math.exp %138 : vector<16x16xf32>
    %cst_41 = arith.constant dense<0.000000e+00> : vector<16xf32>
    %140 = vector.multi_reduction <add>, %139, %cst_41 [1] : vector<16x16xf32> to vector<16xf32>
    %141 = vector.shape_cast %140 : vector<16xf32> to vector<16x1xf32>
    %142 = tpu.reciprocal %141 {approx = true} : vector<16x1xf32> -> vector<16x1xf32>
    %143 = vector.broadcast %142 : vector<16x1xf32> to vector<16x16xf32>
    %144 = arith.mulf %139, %143 : vector<16x16xf32>
    %145 = arith.truncf %144 : vector<16x16xf32> to vector<16x16xbf16>
    %cst_42 = arith.constant dense<0.000000e+00> : vector<16x32xf32>
    %146 = tpu.matmul %145, %129, %cst_42 {dimension_numbers = #tpu.dot_dimension_numbers<[1], [0], [0], [1], [0, 0, 1, 1], [], []>} : vector<16x16xbf16>, vector<16x32xbf16>, vector<16x32xf32> -> vector<16x32xf32>
    %147 = tpu.concatenate %77, %100, %123, %146 in 1 : vector<16x32xf32>, vector<16x32xf32>, vector<16x32xf32>, vector<16x32xf32> -> vector<16x128xf32>
    %148 = vector.extract_strided_slice %41 {offsets = [16, 0], sizes = [16, 128], strides = [1, 1]} : vector<32x384xf32> to vector<16x128xf32>
    %149 = vector.extract_strided_slice %41 {offsets = [16, 128], sizes = [16, 128], strides = [1, 1]} : vector<32x384xf32> to vector<16x128xf32>
    %150 = vector.extract_strided_slice %41 {offsets = [16, 256], sizes = [16, 128], strides = [1, 1]} : vector<32x384xf32> to vector<16x128xf32>
    %151 = vector.extract_strided_slice %42 {offsets = [1, 0, 0], sizes = [1, 1, 9], strides = [1, 1, 1]} : vector<2x1x9xf32> to vector<1x1x9xf32>
    %152 = vector.shape_cast %151 : vector<1x1x9xf32> to vector<1x9xf32>
    %cst_43 = arith.constant 0.000000e+00 : f32
    %153 = vector.broadcast %cst_43 : f32 to vector<1x9xf32>
    %154 = arith.cmpf oeq, %152, %153 : vector<1x9xf32>
    %cst_44 = arith.constant -1.000000e+09 : f32
    %cst_45 = arith.constant 0.000000e+00 : f32
    %155 = vector.broadcast %cst_44 : f32 to vector<1x9xf32>
    %156 = vector.broadcast %cst_45 : f32 to vector<1x9xf32>
    %157 = arith.select %154, %155, %156 : vector<1x9xi1>, vector<1x9xf32>
    %cst_46 = arith.constant -1.000000e+09 : f32
    %158 = vector.broadcast %cst_46 : f32 to vector<1x7xf32>
    %159 = tpu.concatenate %157, %158 in 1 : vector<1x9xf32>, vector<1x7xf32> -> vector<1x16xf32>
    %160 = vector.extract_strided_slice %148 {offsets = [0, 0], sizes = [16, 32], strides = [1, 1]} : vector<16x128xf32> to vector<16x32xf32>
    %161 = arith.truncf %160 : vector<16x32xf32> to vector<16x32xbf16>
    %162 = vector.extract_strided_slice %149 {offsets = [0, 0], sizes = [16, 32], strides = [1, 1]} : vector<16x128xf32> to vector<16x32xf32>
    %163 = arith.truncf %162 : vector<16x32xf32> to vector<16x32xbf16>
    %164 = vector.extract_strided_slice %150 {offsets = [0, 0], sizes = [16, 32], strides = [1, 1]} : vector<16x128xf32> to vector<16x32xf32>
    %165 = arith.truncf %164 : vector<16x32xf32> to vector<16x32xbf16>
    %cst_47 = arith.constant dense<0.000000e+00> : vector<16x16xf32>
    %166 = tpu.matmul %161, %163, %cst_47 {dimension_numbers = #tpu.dot_dimension_numbers<[1], [1], [0], [0], [0, 0, 1, 0], [], []>} : vector<16x32xbf16>, vector<16x32xbf16>, vector<16x16xf32> -> vector<16x16xf32>
    %cst_48 = arith.constant 0.176776692 : f32
    %167 = vector.broadcast %cst_48 : f32 to vector<16x16xf32>
    %168 = arith.mulf %166, %167 : vector<16x16xf32>
    %169 = vector.broadcast %159 : vector<1x16xf32> to vector<16x16xf32>
    %170 = arith.addf %168, %169 : vector<16x16xf32>
    %cst_49 = arith.constant dense<0xFF800000> : vector<16xf32>
    %171 = vector.multi_reduction <maximumf>, %170, %cst_49 [1] : vector<16x16xf32> to vector<16xf32>
    %172 = vector.shape_cast %171 : vector<16xf32> to vector<16x1xf32>
    %173 = vector.broadcast %172 : vector<16x1xf32> to vector<16x16xf32>
    %174 = arith.subf %170, %173 : vector<16x16xf32>
    %175 = math.exp %174 : vector<16x16xf32>
    %cst_50 = arith.constant dense<0.000000e+00> : vector<16xf32>
    %176 = vector.multi_reduction <add>, %175, %cst_50 [1] : vector<16x16xf32> to vector<16xf32>
    %177 = vector.shape_cast %176 : vector<16xf32> to vector<16x1xf32>
    %178 = tpu.reciprocal %177 {approx = true} : vector<16x1xf32> -> vector<16x1xf32>
    %179 = vector.broadcast %178 : vector<16x1xf32> to vector<16x16xf32>
    %180 = arith.mulf %175, %179 : vector<16x16xf32>
    %181 = arith.truncf %180 : vector<16x16xf32> to vector<16x16xbf16>
    %cst_51 = arith.constant dense<0.000000e+00> : vector<16x32xf32>
    %182 = tpu.matmul %181, %165, %cst_51 {dimension_numbers = #tpu.dot_dimension_numbers<[1], [0], [0], [1], [0, 0, 1, 1], [], []>} : vector<16x16xbf16>, vector<16x32xbf16>, vector<16x32xf32> -> vector<16x32xf32>
    %183 = vector.extract_strided_slice %148 {offsets = [0, 32], sizes = [16, 32], strides = [1, 1]} : vector<16x128xf32> to vector<16x32xf32>
    %184 = arith.truncf %183 : vector<16x32xf32> to vector<16x32xbf16>
    %185 = vector.extract_strided_slice %149 {offsets = [0, 32], sizes = [16, 32], strides = [1, 1]} : vector<16x128xf32> to vector<16x32xf32>
    %186 = arith.truncf %185 : vector<16x32xf32> to vector<16x32xbf16>
    %187 = vector.extract_strided_slice %150 {offsets = [0, 32], sizes = [16, 32], strides = [1, 1]} : vector<16x128xf32> to vector<16x32xf32>
    %188 = arith.truncf %187 : vector<16x32xf32> to vector<16x32xbf16>
    %cst_52 = arith.constant dense<0.000000e+00> : vector<16x16xf32>
    %189 = tpu.matmul %184, %186, %cst_52 {dimension_numbers = #tpu.dot_dimension_numbers<[1], [1], [0], [0], [0, 0, 1, 0], [], []>} : vector<16x32xbf16>, vector<16x32xbf16>, vector<16x16xf32> -> vector<16x16xf32>
    %cst_53 = arith.constant 0.176776692 : f32
    %190 = vector.broadcast %cst_53 : f32 to vector<16x16xf32>
    %191 = arith.mulf %189, %190 : vector<16x16xf32>
    %192 = vector.broadcast %159 : vector<1x16xf32> to vector<16x16xf32>
    %193 = arith.addf %191, %192 : vector<16x16xf32>
    %cst_54 = arith.constant dense<0xFF800000> : vector<16xf32>
    %194 = vector.multi_reduction <maximumf>, %193, %cst_54 [1] : vector<16x16xf32> to vector<16xf32>
    %195 = vector.shape_cast %194 : vector<16xf32> to vector<16x1xf32>
    %196 = vector.broadcast %195 : vector<16x1xf32> to vector<16x16xf32>
    %197 = arith.subf %193, %196 : vector<16x16xf32>
    %198 = math.exp %197 : vector<16x16xf32>
    %cst_55 = arith.constant dense<0.000000e+00> : vector<16xf32>
    %199 = vector.multi_reduction <add>, %198, %cst_55 [1] : vector<16x16xf32> to vector<16xf32>
    %200 = vector.shape_cast %199 : vector<16xf32> to vector<16x1xf32>
    %201 = tpu.reciprocal %200 {approx = true} : vector<16x1xf32> -> vector<16x1xf32>
    %202 = vector.broadcast %201 : vector<16x1xf32> to vector<16x16xf32>
    %203 = arith.mulf %198, %202 : vector<16x16xf32>
    %204 = arith.truncf %203 : vector<16x16xf32> to vector<16x16xbf16>
    %cst_56 = arith.constant dense<0.000000e+00> : vector<16x32xf32>
    %205 = tpu.matmul %204, %188, %cst_56 {dimension_numbers = #tpu.dot_dimension_numbers<[1], [0], [0], [1], [0, 0, 1, 1], [], []>} : vector<16x16xbf16>, vector<16x32xbf16>, vector<16x32xf32> -> vector<16x32xf32>
    %206 = vector.extract_strided_slice %148 {offsets = [0, 64], sizes = [16, 32], strides = [1, 1]} : vector<16x128xf32> to vector<16x32xf32>
    %207 = arith.truncf %206 : vector<16x32xf32> to vector<16x32xbf16>
    %208 = vector.extract_strided_slice %149 {offsets = [0, 64], sizes = [16, 32], strides = [1, 1]} : vector<16x128xf32> to vector<16x32xf32>
    %209 = arith.truncf %208 : vector<16x32xf32> to vector<16x32xbf16>
    %210 = vector.extract_strided_slice %150 {offsets = [0, 64], sizes = [16, 32], strides = [1, 1]} : vector<16x128xf32> to vector<16x32xf32>
    %211 = arith.truncf %210 : vector<16x32xf32> to vector<16x32xbf16>
    %cst_57 = arith.constant dense<0.000000e+00> : vector<16x16xf32>
    %212 = tpu.matmul %207, %209, %cst_57 {dimension_numbers = #tpu.dot_dimension_numbers<[1], [1], [0], [0], [0, 0, 1, 0], [], []>} : vector<16x32xbf16>, vector<16x32xbf16>, vector<16x16xf32> -> vector<16x16xf32>
    %cst_58 = arith.constant 0.176776692 : f32
    %213 = vector.broadcast %cst_58 : f32 to vector<16x16xf32>
    %214 = arith.mulf %212, %213 : vector<16x16xf32>
    %215 = vector.broadcast %159 : vector<1x16xf32> to vector<16x16xf32>
    %216 = arith.addf %214, %215 : vector<16x16xf32>
    %cst_59 = arith.constant dense<0xFF800000> : vector<16xf32>
    %217 = vector.multi_reduction <maximumf>, %216, %cst_59 [1] : vector<16x16xf32> to vector<16xf32>
    %218 = vector.shape_cast %217 : vector<16xf32> to vector<16x1xf32>
    %219 = vector.broadcast %218 : vector<16x1xf32> to vector<16x16xf32>
    %220 = arith.subf %216, %219 : vector<16x16xf32>
    %221 = math.exp %220 : vector<16x16xf32>
    %cst_60 = arith.constant dense<0.000000e+00> : vector<16xf32>
    %222 = vector.multi_reduction <add>, %221, %cst_60 [1] : vector<16x16xf32> to vector<16xf32>
    %223 = vector.shape_cast %222 : vector<16xf32> to vector<16x1xf32>
    %224 = tpu.reciprocal %223 {approx = true} : vector<16x1xf32> -> vector<16x1xf32>
    %225 = vector.broadcast %224 : vector<16x1xf32> to vector<16x16xf32>
    %226 = arith.mulf %221, %225 : vector<16x16xf32>
    %227 = arith.truncf %226 : vector<16x16xf32> to vector<16x16xbf16>
    %cst_61 = arith.constant dense<0.000000e+00> : vector<16x32xf32>
    %228 = tpu.matmul %227, %211, %cst_61 {dimension_numbers = #tpu.dot_dimension_numbers<[1], [0], [0], [1], [0, 0, 1, 1], [], []>} : vector<16x16xbf16>, vector<16x32xbf16>, vector<16x32xf32> -> vector<16x32xf32>
    %229 = vector.extract_strided_slice %148 {offsets = [0, 96], sizes = [16, 32], strides = [1, 1]} : vector<16x128xf32> to vector<16x32xf32>
    %230 = arith.truncf %229 : vector<16x32xf32> to vector<16x32xbf16>
    %231 = vector.extract_strided_slice %149 {offsets = [0, 96], sizes = [16, 32], strides = [1, 1]} : vector<16x128xf32> to vector<16x32xf32>
    %232 = arith.truncf %231 : vector<16x32xf32> to vector<16x32xbf16>
    %233 = vector.extract_strided_slice %150 {offsets = [0, 96], sizes = [16, 32], strides = [1, 1]} : vector<16x128xf32> to vector<16x32xf32>
    %234 = arith.truncf %233 : vector<16x32xf32> to vector<16x32xbf16>
    %cst_62 = arith.constant dense<0.000000e+00> : vector<16x16xf32>
    %235 = tpu.matmul %230, %232, %cst_62 {dimension_numbers = #tpu.dot_dimension_numbers<[1], [1], [0], [0], [0, 0, 1, 0], [], []>} : vector<16x32xbf16>, vector<16x32xbf16>, vector<16x16xf32> -> vector<16x16xf32>
    %cst_63 = arith.constant 0.176776692 : f32
    %236 = vector.broadcast %cst_63 : f32 to vector<16x16xf32>
    %237 = arith.mulf %235, %236 : vector<16x16xf32>
    %238 = vector.broadcast %159 : vector<1x16xf32> to vector<16x16xf32>
    %239 = arith.addf %237, %238 : vector<16x16xf32>
    %cst_64 = arith.constant dense<0xFF800000> : vector<16xf32>
    %240 = vector.multi_reduction <maximumf>, %239, %cst_64 [1] : vector<16x16xf32> to vector<16xf32>
    %241 = vector.shape_cast %240 : vector<16xf32> to vector<16x1xf32>
    %242 = vector.broadcast %241 : vector<16x1xf32> to vector<16x16xf32>
    %243 = arith.subf %239, %242 : vector<16x16xf32>
    %244 = math.exp %243 : vector<16x16xf32>
    %cst_65 = arith.constant dense<0.000000e+00> : vector<16xf32>
    %245 = vector.multi_reduction <add>, %244, %cst_65 [1] : vector<16x16xf32> to vector<16xf32>
    %246 = vector.shape_cast %245 : vector<16xf32> to vector<16x1xf32>
    %247 = tpu.reciprocal %246 {approx = true} : vector<16x1xf32> -> vector<16x1xf32>
    %248 = vector.broadcast %247 : vector<16x1xf32> to vector<16x16xf32>
    %249 = arith.mulf %244, %248 : vector<16x16xf32>
    %250 = arith.truncf %249 : vector<16x16xf32> to vector<16x16xbf16>
    %cst_66 = arith.constant dense<0.000000e+00> : vector<16x32xf32>
    %251 = tpu.matmul %250, %234, %cst_66 {dimension_numbers = #tpu.dot_dimension_numbers<[1], [0], [0], [1], [0, 0, 1, 1], [], []>} : vector<16x16xbf16>, vector<16x32xbf16>, vector<16x32xf32> -> vector<16x32xf32>
    %252 = tpu.concatenate %182, %205, %228, %251 in 1 : vector<16x32xf32>, vector<16x32xf32>, vector<16x32xf32>, vector<16x32xf32> -> vector<16x128xf32>
    %253 = tpu.concatenate %147, %252 in 0 : vector<16x128xf32>, vector<16x128xf32> -> vector<32x128xf32>
    %254 = arith.truncf %253 : vector<32x128xf32> to vector<32x128xbf16>
    %c0_67 = arith.constant 0 : index
    %c0_68 = arith.constant 0 : index
    %255 = vector.load %arg5[%c0_67, %c0_68] : memref<128x128xbf16, #tpu.memory_space<vmem>>, vector<128x128xbf16>
    %cst_69 = arith.constant dense<0.000000e+00> : vector<32x128xf32>
    %256 = tpu.matmul %254, %255, %cst_69 {dimension_numbers = #tpu.dot_dimension_numbers<[1], [0], [0], [1], [0, 0, 1, 1], [], []>} : vector<32x128xbf16>, vector<128x128xbf16>, vector<32x128xf32> -> vector<32x128xf32>
    %257 = vector.broadcast %5 : vector<1x128xf32> to vector<32x128xf32>
    %258 = arith.addf %256, %257 : vector<32x128xf32>
    %259 = arith.addf %14, %258 : vector<32x128xf32>
    %cst_70 = arith.constant dense<0.000000e+00> : vector<32xf32>
    %260 = vector.multi_reduction <add>, %259, %cst_70 [1] : vector<32x128xf32> to vector<32xf32>
    %261 = vector.shape_cast %260 : vector<32xf32> to vector<32x1xf32>
    %cst_71 = arith.constant 1.280000e+02 : f32
    %262 = vector.broadcast %cst_71 : f32 to vector<32x1xf32>
    %263 = arith.divf %261, %262 : vector<32x1xf32>
    %264 = vector.broadcast %263 : vector<32x1xf32> to vector<32x128xf32>
    %265 = arith.subf %259, %264 : vector<32x128xf32>
    %266 = arith.mulf %265, %265 : vector<32x128xf32>
    %cst_72 = arith.constant dense<0.000000e+00> : vector<32xf32>
    %267 = vector.multi_reduction <add>, %266, %cst_72 [1] : vector<32x128xf32> to vector<32xf32>
    %268 = vector.shape_cast %267 : vector<32xf32> to vector<32x1xf32>
    %cst_73 = arith.constant 0.00787401571 : f32
    %269 = vector.broadcast %cst_73 : f32 to vector<32x1xf32>
    %270 = arith.mulf %268, %269 : vector<32x1xf32>
    %271 = math.sqrt %270 : vector<32x1xf32>
    %cst_74 = arith.constant 9.99999997E-7 : f32
    %272 = vector.broadcast %cst_74 : f32 to vector<32x1xf32>
    %273 = arith.addf %271, %272 : vector<32x1xf32>
    %274 = tpu.reciprocal %273 {approx = true} : vector<32x1xf32> -> vector<32x1xf32>
    %275 = vector.broadcast %274 : vector<32x1xf32> to vector<32x128xf32>
    %276 = arith.mulf %265, %275 : vector<32x128xf32>
    %277 = vector.broadcast %3 : vector<1x128xf32> to vector<32x128xf32>
    %278 = arith.mulf %277, %276 : vector<32x128xf32>
    %279 = vector.broadcast %4 : vector<1x128xf32> to vector<32x128xf32>
    %280 = arith.addf %278, %279 : vector<32x128xf32>
    %281 = arith.truncf %280 : vector<32x128xf32> to vector<32x128xbf16>
    %c0_75 = arith.constant 0 : index
    %c0_76 = arith.constant 0 : index
    %282 = vector.load %arg6[%c0_75, %c0_76] : memref<128x256xbf16, #tpu.memory_space<vmem>>, vector<128x256xbf16>
    %cst_77 = arith.constant dense<0.000000e+00> : vector<32x256xf32>
    %283 = tpu.matmul %281, %282, %cst_77 {dimension_numbers = #tpu.dot_dimension_numbers<[1], [0], [0], [1], [0, 0, 1, 1], [], []>} : vector<32x128xbf16>, vector<128x256xbf16>, vector<32x256xf32> -> vector<32x256xf32>
    %c0_78 = arith.constant 0 : index
    %c0_79 = arith.constant 0 : index
    %284 = vector.load %arg7[%c0_78, %c0_79] : memref<1x256xf32, #tpu.memory_space<vmem>>, vector<1x256xf32>
    %285 = vector.broadcast %284 : vector<1x256xf32> to vector<32x256xf32>
    %286 = arith.addf %283, %285 : vector<32x256xf32>
    %cst_80 = arith.constant 0.000000e+00 : f32
    %287 = vector.broadcast %cst_80 : f32 to vector<32x256xf32>
    %288 = arith.maximumf %286, %287 : vector<32x256xf32>
    %289 = arith.truncf %288 : vector<32x256xf32> to vector<32x256xbf16>
    %c0_81 = arith.constant 0 : index
    %c0_82 = arith.constant 0 : index
    %290 = vector.load %arg8[%c0_81, %c0_82] : memref<256x128xbf16, #tpu.memory_space<vmem>>, vector<256x128xbf16>
    %cst_83 = arith.constant dense<0.000000e+00> : vector<32x128xf32>
    %291 = tpu.matmul %289, %290, %cst_83 {dimension_numbers = #tpu.dot_dimension_numbers<[1], [0], [0], [1], [0, 0, 1, 1], [], []>} : vector<32x256xbf16>, vector<256x128xbf16>, vector<32x128xf32> -> vector<32x128xf32>
    %292 = vector.broadcast %6 : vector<1x128xf32> to vector<32x128xf32>
    %293 = arith.addf %291, %292 : vector<32x128xf32>
    %294 = arith.addf %259, %293 : vector<32x128xf32>
    %295 = vector.extract_strided_slice %294 {offsets = [0, 0], sizes = [9, 128], strides = [1, 1]} : vector<32x128xf32> to vector<9x128xf32>
    %c0_84 = arith.constant 0 : index
    %c0_85 = arith.constant 0 : index
    %c0_86 = arith.constant 0 : index
    %296 = vector.load %arg10[%c0_84, %c0_85, %c0_86] : memref<2x9x128xf32, #tpu.memory_space<vmem>>, vector<1x9x128xf32>
    %297 = vector.shape_cast %296 : vector<1x9x128xf32> to vector<9x128xf32>
    %298 = vector.shape_cast %295 : vector<9x128xf32> to vector<1x9x128xf32>
    tpu.vector_store %arg10[%c0_84, %c0_85, %c0_86], %298 {strides = array<i32>} : memref<2x9x128xf32, #tpu.memory_space<vmem>>, vector<1x9x128xf32>,
    %299 = vector.extract_strided_slice %294 {offsets = [16, 0], sizes = [9, 128], strides = [1, 1]} : vector<32x128xf32> to vector<9x128xf32>
    %c1 = arith.constant 1 : index
    %c0_87 = arith.constant 0 : index
    %c0_88 = arith.constant 0 : index
    %300 = vector.load %arg10[%c1, %c0_87, %c0_88] : memref<2x9x128xf32, #tpu.memory_space<vmem>>, vector<1x9x128xf32>
    %301 = vector.shape_cast %300 : vector<1x9x128xf32> to vector<9x128xf32>
    %302 = vector.shape_cast %299 : vector<9x128xf32> to vector<1x9x128xf32>
    tpu.vector_store %arg10[%c1, %c0_87, %c0_88], %302 {strides = array<i32>} : memref<2x9x128xf32, #tpu.memory_space<vmem>>, vector<1x9x128xf32>,
    return
  }
  func.func @transform_0(%arg0: i32) -> (i32, i32, i32) {
    %c0_i32 = arith.constant 0 : i32
    %c0_i32_0 = arith.constant 0 : i32
    %c0_i32_1 = arith.constant 0 : i32
    return %arg0, %c0_i32, %c0_i32_0 : i32, i32, i32
  }
  func.func @transform_1(%arg0: i32) -> (i32, i32, i32) {
    %c0_i32 = arith.constant 0 : i32
    %c0_i32_0 = arith.constant 0 : i32
    %c0_i32_1 = arith.constant 0 : i32
    return %arg0, %c0_i32, %c0_i32_0 : i32, i32, i32
  }
  func.func @transform_2(%arg0: i32) -> (i32, i32) {
    %c0_i32 = arith.constant 0 : i32
    %c0_i32_0 = arith.constant 0 : i32
    %c0_i32_1 = arith.constant 0 : i32
    return %c0_i32, %c0_i32_0 : i32, i32
  }
  func.func @transform_3(%arg0: i32) -> (i32, i32) {
    %c0_i32 = arith.constant 0 : i32
    %c0_i32_0 = arith.constant 0 : i32
    %c0_i32_1 = arith.constant 0 : i32
    return %c0_i32, %c0_i32_0 : i32, i32
  }
  func.func @transform_4(%arg0: i32) -> (i32, i32) {
    %c0_i32 = arith.constant 0 : i32
    %c0_i32_0 = arith.constant 0 : i32
    %c0_i32_1 = arith.constant 0 : i32
    return %c0_i32, %c0_i32_0 : i32, i32
  }
  func.func @transform_5(%arg0: i32) -> (i32, i32) {
    %c0_i32 = arith.constant 0 : i32
    %c0_i32_0 = arith.constant 0 : i32
    %c0_i32_1 = arith.constant 0 : i32
    return %c0_i32, %c0_i32_0 : i32, i32
  }
  func.func @transform_6(%arg0: i32) -> (i32, i32) {
    %c0_i32 = arith.constant 0 : i32
    %c0_i32_0 = arith.constant 0 : i32
    %c0_i32_1 = arith.constant 0 : i32
    return %c0_i32, %c0_i32_0 : i32, i32
  }
  func.func @transform_7(%arg0: i32) -> (i32, i32) {
    %c0_i32 = arith.constant 0 : i32
    %c0_i32_0 = arith.constant 0 : i32
    %c0_i32_1 = arith.constant 0 : i32
    return %c0_i32, %c0_i32_0 : i32, i32
  }
  func.func @transform_8(%arg0: i32) -> (i32, i32) {
    %c0_i32 = arith.constant 0 : i32
    %c0_i32_0 = arith.constant 0 : i32
    %c0_i32_1 = arith.constant 0 : i32
    return %c0_i32, %c0_i32_0 : i32, i32
  }
  func.func @transform_9(%arg0: i32) -> (i32, i32, i32) {
    %c0_i32 = arith.constant 0 : i32
    %c0_i32_0 = arith.constant 0 : i32
    %c0_i32_1 = arith.constant 0 : i32
    return %arg0, %c0_i32, %c0_i32_0 : i32, i32, i32
  }
}

</mosaic_0001>

<bundles_post_ra>
// kernel: tpu_custom_call.1
= control target key start
LH: loop header
LB: loop body
LE: loop exit
PB: predicated region body
PF: predicated region fallthrough
CT: control target
= control target key end

     0   :  { %s3726_s0 = inlined_call_operand.hbm [shape: f32[4,8,128], index: 0, kind: input, shape index: {}]   ;;  %s3727_s1 = inlined_call_operand.hbm [shape: f32[4,1,9], index: 1, kind: input, shape index: {}]   ;;  %s3728_s2 = inlined_call_operand.hbm [shape: bf16[128,384], index: 2, kind: input, shape index: {}]   ;;  %s3729_s3 = inlined_call_operand.hbm [shape: f32[1,384], index: 3, kind: input, shape index: {}]   ;;  %s3730_s4 = inlined_call_operand.hbm [shape: bf16[128,128], index: 4, kind: input, shape index: {}]   ;;  %s3731_s5 = inlined_call_operand.hbm [shape: bf16[128,256], index: 5, kind: input, shape index: {}]   ;;  %s3732_s6 = inlined_call_operand.vmem [shape: f32[1,256], index: 6, kind: input, shape index: {}]   ;;  %s3733_s7 = inlined_call_operand.hbm [shape: bf16[256,128], index: 7, kind: input, shape index: {}]   ;;  %s3734_s8 = inlined_call_operand.hbm [shape: f32[6,128], index: 8, kind: input, shape index: {}]   ;;  %s3735_s9 = inlined_call_operand.vmem [shape: f32[4,9,128], index: 9, kind: output, shape index: {}]  }
   0x1   :  { %3738 = sst [smem:[#allocation21_spill]] %s3728_s2 }
   0x2   :  { %3739 = sst [smem:[#allocation22_spill]] %s3729_s3 }
   0x3   :  { %3740 = sst [smem:[#allocation23_spill]] %s3730_s4 }
   0x4   :  { %3741 = sst [smem:[#allocation24_spill]] %s3731_s5 }
   0x5   :  { %3742 = sst [smem:[#allocation25_spill]] %s3733_s7 }
   0x6   :  { %14 = vsyncpa [#allocation3], 0 }
   0x7   :  { %16 = vsyncpa [#allocation3 + $0x1], 0 }
   0x8   :  { %17 = vsyncpa [#allocation5], 0 }
   0x9   :  { %19 = vsyncpa [#allocation5 + $0x1], 0 }
   0xa   :  { %20 = vsyncpa [#allocation8], 0 }
   0xb   :  { %21 = vsyncpa [#allocation11], 0 }
   0xc   :  { %22 = vsyncpa [#allocation14], 0  ;;  %s3165_s30 = smov 0   ;;  %s3167_s10 = smov 0  }
   0xd   :  { %s3169_s11 = smov 0   ;;  %s3171_s12 = smov 0  }
   0xe LB: > { %s3743_s2 = sld [smem:[#allocation21_spill]]  ;;  %s3189_s16 = sadd.s32 4294967295, %s3093_s12   ;;  %s3093_s12 = sphi %s3171_s12, %s3757_s12   ;;  %s3089_s11 = sphi %s3169_s11, %s3756_s11   ;;  %s3085_s10 = sphi %s3167_s10, %s3755_s10   ;;  %s3081_s30 = sphi %s3165_s30, %s3754_s30  }
   0xf   : > { %p2182_p0 = scmp.ge.s32.totalorder %s3093_s12, 1  ;;  %p49_p1 = scmp.eq.s32.totalorder %s3189_s16, 0 }
  0x10   : > { %p258_p2 = scmp.lt.s32.totalorder %s3093_s12, 3  ;;  %s3095_s18 = smov [#allocation6]  }
  0x11   : > { %s271_s19 = sshll.u32 %s3095_s18, 4  ;;  %s3745_s3 = sld [smem:[#allocation22_spill]]  ;;  %s272_s19 = int_to_ptr.vmem [resolvable:$true] %s271_s19 }
  0x12   : > { %p3194_p3 = pnand %p2182_p0, %p258_p2  ;;  %s3747_s5 = sld [smem:[#allocation24_spill]] }
  0x13   : > { %s3096_s27 = smov [#allocation7]   ;;  %s3097_s29 = smov 192  }
  0x14   : > { %s269_s15 = sshll.u32 %s3743_s2, 4  ;;  %p2577_p4 = pneg %p3194_p3  ;;  %s270_s15 = int_to_ptr.hbm [resolvable:$true] %s269_s15 }
  0x15   : > { %s286_s28 = sshll.u32 %s3096_s27, 4  ;;  %s3098_s13 = smov 12   ;;  %s287_s28 = int_to_ptr.vmem [resolvable:$true] %s286_s28 }
  0x16   : > { %p3205_p5 = pnand %p2577_p4, %p49_p1  ;;  %s3099_s14 = smov [#allocation10]  }
  0x17   : > { %s284_s22 = sshll.u32 %s3745_s3, 4  ;;  %s311_s18 = sshll.u32 %s3099_s14, 4  ;;  %s285_s22 = int_to_ptr.hbm [resolvable:$true] %s284_s22  ;;  %s312_s18 = int_to_ptr.vmem [resolvable:$true] %s311_s18 }
  0x18   : > { %s309_s26 = sshll.u32 %s3747_s5, 4  ;;  %s3748_s4 = sld [smem:[#allocation23_spill]]  ;;  %s310_s26 = int_to_ptr.hbm [resolvable:$true] %s309_s26 }
  0x19   : > { %2580 = dma.hbm_to_vmem [thread:$0]  (!%p3205_p5), %s270_s15, 3072, %s272_s19, [#allocation5], %s3097_s29, %s3097_s29, %s3098_s13  }
  0x1a   : > { %2583 = dma.hbm_to_vmem [thread:$0]  (!%p3205_p5), %s285_s22, 48, %s287_s28, [#allocation8]  }
  0x1b   : > { %s3736_s25 = smov 128   ;;  %s3737_s2 = smov 8  }
  0x1c   : > { %2589 = dma.hbm_to_vmem [thread:$0]  (!%p3205_p5), %s310_s26, 2048, %s312_s18, [#allocation11], %s3736_s25, %s3736_s25, %s3737_s2  }
  0x1d   : > { %s3102_s15 = smov [#allocation9]   ;;  %s3103_s22 = smov 64  }
  0x1e   : > { %s295_s24 = sshll.u32 %s3748_s4, 4  ;;  %s297_s19 = sshll.u32 %s3102_s15, 4  ;;  %s296_s24 = int_to_ptr.hbm [resolvable:$true] %s295_s24  ;;  %s298_s19 = int_to_ptr.vmem [resolvable:$true] %s297_s19 }
  0x1f   : > { %s3104_s27 = smov 4   ;;  %s3749_s7 = sld [smem:[#allocation25_spill]] }
  0x20   : > { %2586 = dma.hbm_to_vmem [thread:$0]  (!%p3205_p5), %s296_s24, 1024, %s298_s19, [#allocation8], %s3103_s22, %s3103_s22, %s3104_s27  }
  0x21   : > { %s3105_s26 = smov [#allocation12]   ;;  %s341_s21 = sshll.u32 %s3734_s8, 4  ;;  %s342_s21 = int_to_ptr.hbm [resolvable:$true] %s341_s21 }
  0x22   : > { %s328_s14 = sshll.u32 %s3105_s26, 4  ;;  %s3106_s24 = smov [#allocation13]   ;;  %s329_s14 = int_to_ptr.vmem [resolvable:$true] %s328_s14 }
  0x23   : > { %s343_s15 = sshll.u32 %s3106_s24, 4  ;;  %s3237_s19 = sadd.s32 1, %s3093_s12   ;;  %s344_s15 = int_to_ptr.vmem [resolvable:$true] %s343_s15 }
  0x24   : > { %2595 = dma.hbm_to_vmem [thread:$0]  (!%p3205_p5), %s342_s21, 128, %s344_s15, [#allocation14]  }
  0x25   : > { %s326_s13 = sshll.u32 %s3749_s7, 4  ;;  %s35_s28 = sadd.s32 1, %s3089_s11  ;;  %s327_s13 = int_to_ptr.hbm [resolvable:$true] %s326_s13 }
  0x26   : > { %2592 = dma.hbm_to_vmem [thread:$0]  (!%p3205_p5), %s327_s13, 2048, %s329_s14, [#allocation11], %s3103_s22, %s3103_s22, %s3104_s27  }
  0x27   : > { %s32_s29 = ssub.s32 %s3093_s12, %s3237_s19  ;;  %p42_p6 = scmp.ne.s32.totalorder %s3089_s11, %s3085_s10 }
  0x28   : > { %p33_p7 = scmp.eq.s32.totalorder %s32_s29, 0  ;;  %p43_p8 = scmp.eq.s32.totalorder %s3093_s12, 0 }
  0x29   : > { %p48_p9 = scmp.ne.s32.totalorder %s3085_s10, %s3081_s30  ;;  %p2609_p10 = scmp.lt.s32.totalorder %s3093_s12, 2 }
  0x2a   : > { %s3249_s22 = scalar_select %p33_p7, %s3089_s11, %s35_s28  }
  0x2b   : > { %p44_p11 = por %p43_p8, %p42_p6  ;;  %p3253_p12 = por %p49_p1, %p48_p9 }
  0x2c   : > { %s3258_s23 = sand.u32 1, %s3089_s11   ;;  %s2483_s13 = sshll.u32 %s3093_s12, 4 }
  0x2d   : > { %s2190_s26 = sshll.u32 %s3258_s23, 4  ;;  %s363_s30 = scalar_lea.hbm %s3726_s0, %s2483_s13 }
  0x2e   : > { %s364_s20 = sshll.u32 %s363_s30, 4  ;;  %s358_s21 = scalar_lea.vmem [#allocation2], %s2190_s26  ;;  %s365_s20 = int_to_ptr.hbm [resolvable:$true] %s364_s20 }
  0x2f   : > { %s366_s24 = sshll.u32 %s358_s21, 4  ;;  %p3267_p13 = pnand %p2609_p10, %p44_p11  ;;  %s367_s24 = int_to_ptr.vmem [resolvable:$true] %s366_s24 }
  0x30   : > { %s376_s28 = sand.u32 1, %s3093_s12   ;;  %s2193_s29 = sshll.u32 %s3258_s23, 1 }
  0x31   : > { %s355_s25 = scalar_lea.sflag [#allocation3], %s3258_s23  ;;  %s2979_s2 = sshra.s32 %s365_s20, 4  ;;  %s2980_s2 = int_to_ptr.hbm [resolvable:$true] %s2979_s2 }
  0x32   : > { %s2981_s3 = scalar_lea.hbm %s2980_s2, 16  ;;  %p2983_p2 = pneg %p3267_p13 }
  0x33   : > { %p2982_p0 = scmp.ne.s32.totalorder %s2980_s2, %s2981_s3  ;;  %s2986_s14 = scalar_lea.hbm %s3726_s0, 32 }
  0x34   : > { %p2987_p6 = scmp.lt.s32.totalorder %s2980_s2, %s3726_s0  ;;  %p2988_p7 = scmp.lt.s32.totalorder %s2986_s14, %s2981_s3 }
  0x35   : > { %p2984_p4 = pnand %p2983_p2, %p2982_p0 }
  0x36   : > { %p2989_p8 = por %p2988_p7, %p2987_p6 }
  0x37   : > { %p2985_p5 = pneg %p2984_p4 }
  0x39   : > { %p2990_p9 = pnand %p2989_p8, %p2985_p5 }
  0x3b   : > { %2993 = shalt.err (!%p2990_p9)
}
  0x3c   : > { %s3752_s23 = smov 8   ;;  %s3753_s21 = smov 128  }
  0x3d   : > { %2599 = dma.hbm_to_vmem [thread:$0]  (!%p3267_p13), %s365_s20, 256, %s367_s24, %s355_s25, %s3753_s21, %s3753_s21, %s3752_s23  }
  0x3e   : > { %s2194_s4 = sshll.u32 %s3093_s12, 1  ;;  %s380_s5 = scalar_lea.vmem [#allocation4], %s2193_s29 }
  0x3f   : > { %s387_s13 = sshll.u32 %s380_s5, 4  ;;  %s384_s18 = scalar_lea.hbm %s3727_s1, %s2194_s4  ;;  %s388_s13 = int_to_ptr.vmem [resolvable:$true] %s387_s13 }
  0x40   : > { %s385_s2 = sshll.u32 %s384_s18, 4  ;;  %s377_s3 = scalar_lea.sflag [#allocation5], %s376_s28  ;;  %s386_s2 = int_to_ptr.hbm [resolvable:$true] %s385_s2 }
  0x41   : > { %s3009_s14 = sshra.s32 %s386_s2, 4  ;;  %s3016_s5 = scalar_lea.hbm %s3727_s1, 4  ;;  %s3010_s14 = int_to_ptr.hbm [resolvable:$true] %s3009_s14 }
  0x42   : > { %s3011_s30 = scalar_lea.hbm %s3010_s14, 2  ;;  %p3017_p4 = scmp.lt.s32.totalorder %s3010_s14, %s3727_s1 }
  0x43   : > { %p3012_p10 = scmp.ne.s32.totalorder %s3010_s14, %s3011_s30  ;;  %p3018_p5 = scmp.lt.s32.totalorder %s3016_s5, %s3011_s30 }
  0x45   : > { %p3014_p11 = pnand %p3012_p10, %p2983_p2  ;;  %p3019_p6 = por %p3018_p5, %p3017_p4 }
  0x47   : > { %p3015_p0 = pneg %p3014_p11 }
  0x49   : > { %p3020_p7 = pnand %p3019_p6, %p3015_p0 }
  0x4b   : > { %3023 = shalt.err (!%p3020_p7)
}
  0x4c   : > { %s3107_s4 = smov 16   ;;  %s3108_s7 = smov 1  }
  0x4d   : > { %2602 = dma.hbm_to_vmem [thread:$0]  (!%p3267_p13), %s386_s2, 32, %s388_s13, %s377_s3, %s3107_s4, %s3107_s4, %s3108_s7  }
  0x4e   : > { %399 = sbr.rel (%p3194_p3) target bundleno = 2435 (0x983), region = 56  ;;  %s401_s28 = sand.u32 (!%p3194_p3), 1, %s3085_s10  }
  0x4f   : > { %s2196_s29 = sshll.u32 (!%p3194_p3), %s401_s28, 4  ;;  %s402_s23 = scalar_lea.sflag (!%p3194_p3), [#allocation3], %s401_s28 }
  0x50   : > { %s3308_s21 = scalar_lea.vmem (!%p3194_p3), [#allocation2], %s2196_s29 }
  0x53   : > { %3056 = dma.done.wait (%p3253_p12), %s402_s23, 256  }
  0x54   : > { %3058 = vsyncadd (%p3253_p12), %s402_s23, 4294967040  ;;  %s411_s26 = sand.u32 1, %s3189_s16   ;;  %s2197_s15 = sshll.u32 %s401_s28, 1 }
  0x55   : > { %s412_s13 = scalar_lea.sflag [#allocation5], %s411_s26  ;;  %s3315_s18 = scalar_lea.vmem [#allocation4], %s2197_s15 }
  0x56   : > { %3060 = dma.done.wait (%p3253_p12), %s412_s13, 32  }
  0x57   : > { %3062 = vsyncadd (%p3253_p12), %s412_s13, 4294967264 }
  0x58   : > { %3064 = dma.done.wait (%p49_p1), [#allocation5], 3072  }
  0x59   : > { %3066 = vsyncadd (%p49_p1), [#allocation5], 4294964224 }
  0x5a   : > { %3068 = dma.done.wait (%p49_p1), [#allocation8], 1072  }
  0x5b   : > { %3070 = vsyncadd (%p49_p1), [#allocation8], 4294966224 }
  0x5c   : > { %3072 = dma.done.wait (%p49_p1), [#allocation11], 4096  }
  0x5d   : > { %3074 = vsyncadd (%p49_p1), [#allocation11], 4294963200 }
  0x5e   : > { %3076 = dma.done.wait (%p49_p1), [#allocation14], 128  }
  0x5f   : > { %3078 = vsyncadd (%p49_p1), [#allocation14], 4294967168  ;;  %v3109_v0 = vmov 8.0   ;;  %v498_v2 = vld [vmem:[%s3308_s21] sm:$0xff]  ;;  %vm527_vm1 = vcmask 1040384   ;;  %v3110_v18 = vmov 128.0  }
  0x60   : > { %2698 = vrcp.f32 %v3109_v0  ;;  %v500_v3 = vrot.slane %v498_v2, 4  ;;  %v523_v14 = vrot.slane %v498_v2, 7  ;;  %v499_v21 = vld [vmem:[%s3308_s21 + $0x8] sm:$0xff]  ;;  %v2506_v46 = vld [vmem:[#allocation6 + $0xac] sm:$0xf]  ;;  %vm877_vm11 = vcmask 261120  }
  0x61   : > { %2700 = vrcp.f32 %v3110_v18  ;;  %v506_v22 = vrot.slane %v499_v21, 4  ;;  %v524_v31 = vrot.slane %v499_v21, 7  ;;  %v2293_v44 = vld [vmem:[#allocation6 + $0xa8] sm:$0xf]  ;;  %v2507_v45 = vld [vmem:[#allocation6 + $0xb0] sm:$0xf0] }
  0x62   : > { %v501_v5 = vadd.f32 %v500_v3, %v498_v2  ;;  %v3343_v17 = vsel %vm527_vm1, %v523_v14, 0.0  ;;  %v2294_v47 = vor.u32 %v2507_v45, %v2293_v44  ;;  %v2295_v48 = vld [vmem:[#allocation6 + $0xb4] sm:$0xf0]  ;;  %v2301_v49 = vld [vmem:[#allocation6 + $0xb0] sm:$0xf]  ;;  %vm872_vm13 = vcmask 72704  }
  0x63   : > { %v507_v24 = vadd.f32 %v506_v22, %v499_v21  ;;  %v3358_v38 = vsel %vm527_vm1, %v524_v31, 0.0  ;;  %v2508_v50 = vld [vmem:[#allocation6 + $0xb8] sm:$0xf0]  ;;  %v2298_v51 = vor.u32 %v2506_v46, %v2295_v48  ;;  %v2281_v53 = vld [vmem:[#allocation6 + $0x90] sm:$0xf]  ;;  %vm903_vm14 = vcmask 130048  }
  0x64   : > { %v502_v7 = vrot.slane %v501_v5, 2  ;;  %v2302_v52 = vor.u32 %v2508_v50, %v2301_v49  ;;  %811 = vmatpush.bf16.msra.mxu0 %v2294_v47  ;;  %v2504_v54 = vld [vmem:[#allocation6 + $0x98] sm:$0xf0]  ;;  %v2503_v55 = vld [vmem:[#allocation6 + $0x94] sm:$0xf]  ;;  %s3112_s17 = smov 96  }
  0x65   : > { %v508_v25 = vrot.slane %v507_v24, 2  ;;  %830 = vmatpush.bf16.msra.mxu1 %v2298_v51  ;;  %v2282_v56 = vor.u32 %v2504_v54, %v2281_v53  ;;  %v2283_v57 = vld [vmem:[#allocation6 + $0x9c] sm:$0xf0]  ;;  %v2289_v58 = vld [vmem:[#allocation6 + $0x98] sm:$0xf]  ;;  %s3113_s27 = smov 32  }
  0x66   : > { %v2699_v1 = vpop.eup %2698  ;;  %v503_v9 = vadd.f32 %v502_v7, %v501_v5  ;;  %849 = vmatpush.bf16.msra.mxu2 %v2302_v52  ;;  %v2505_v59 = vld [vmem:[#allocation6 + $0xa0] sm:$0xf0]  ;;  %v2286_v60 = vor.u32 %v2503_v55, %v2283_v57  ;;  %v2269_v62 = vld [vmem:[#allocation6 + $0x78] sm:$0xf]  ;;  %v2500_v0 = vld [vmem:[#allocation6 + $0x7c] sm:$0xf] }
  0x67   : > { %v513_v4 = vmul.f32 8.0, %v2699_v1  ;;  %vm517_vm0 = vweird.f32 %v2699_v1  ;;  %v2701_v19 = vpop.eup %2700  ;;  %v509_v27 = vadd.f32 %v508_v25, %v507_v24  ;;  %v2290_v61 = vor.u32 %v2505_v59, %v2289_v58  ;;  %v2501_v63 = vld [vmem:[#allocation6 + $0x80] sm:$0xf0]  ;;  %v2271_v2 = vld [vmem:[#allocation6 + $0x84] sm:$0xf0]  ;;  %s3114_s2 = smov 64  }
  0x68   : > { %v504_v11 = vrot.slane %v503_v9, 1  ;;  %v541_v20 = vmul.f32 128.0, %v2701_v19  ;;  %vm545_vm2 = vweird.f32 %v2701_v19  ;;  %812 = vmatpush.bf16.msra.mxu0 %v2282_v56  ;;  %v2277_v3 = vld [vmem:[#allocation6 + $0x80] sm:$0xf]  ;;  %v2274_v5 = vor.u32 %v2500_v0, %v2271_v2  ;;  %v2245_v18 = vld [vmem:[#allocation6 + $0x48] sm:$0xf] }
  0x69   : > { %v514_v6 = vsub.f32 1.0, %v513_v4  ;;  %v510_v28 = vrot.slane %v509_v27, 1  ;;  %831 = vmatpush.bf16.msra.mxu1 %v2286_v60  ;;  %v2502_v4 = vld [vmem:[#allocation6 + $0x88] sm:$0xf0]  ;;  %v2257_v7 = vld [vmem:[#allocation6 + $0x60] sm:$0xf] }
  0x6a   : > { %v505_v13 = vadd.f32 %v504_v11, %v503_v9  ;;  %v542_v23 = vsub.f32 1.0, %v541_v20  ;;  %850 = vmatpush.bf16.msra.mxu2 %v2290_v61  ;;  %v2497_v9 = vld [vmem:[#allocation6 + $0x64] sm:$0xf]  ;;  %v2259_v11 = vld [vmem:[#allocation6 + $0x6c] sm:$0xf0]  ;;  %s2204_s30 = sshll.u32 %s3189_s16, 1 }
  0x6b   : > { %v515_v8 = vmul.f32 %v2699_v1, %v514_v6  ;;  %v511_v30 = vadd.f32 %v510_v28, %v509_v27  ;;  %v2278_v6 = vor.u32 %v2502_v4, %v2277_v3  ;;  %v2494_v20 = vld [vmem:[#allocation6 + $0x4c] sm:$0xf]  ;;  %v2247_v21 = vld [vmem:[#allocation6 + $0x54] sm:$0xf0]  ;;  %v2253_v22 = vld [vmem:[#allocation6 + $0x50] sm:$0xf] }
  0x6c   : > { %v543_v26 = vmul.f32 %v2701_v19, %v542_v23  ;;  %v2496_v23 = vld [vmem:[#allocation6 + $0x58] sm:$0xf0]  ;;  %v2250_v25 = vor.u32 %v2494_v20, %v2247_v21  ;;  %v2233_v27 = vld [vmem:[#allocation6 + $0x30] sm:$0xf]  ;;  %v2489_v44 = vld [vmem:[#allocation6 + $0x20] sm:$0xf0] }
  0x6d   : > { %v516_v10 = vadd.f32 %v2699_v1, %v515_v8  ;;  %v2498_v8 = vld [vmem:[#allocation6 + $0x68] sm:$0xf0]  ;;  %832 = vmatpush.bf16.msra.mxu1 %v2274_v5  ;;  %v2492_v28 = vld [vmem:[#allocation6 + $0x38] sm:$0xf0]  ;;  %v2223_v46 = vld [vmem:[#allocation6 + $0x24] sm:$0xf0] }
  0x6e   : > { %v544_v29 = vadd.f32 %v2701_v19, %v543_v26  ;;  %851 = vmatpush.bf16.msra.mxu2 %v2278_v6  ;;  %v2254_v26 = vor.u32 %v2496_v23, %v2253_v22  ;;  %v2488_v45 = vld [vmem:[#allocation6 + $0x1c] sm:$0xf]  ;;  %v2229_v47 = vld [vmem:[#allocation6 + $0x20] sm:$0xf]  ;;  %v2490_v48 = vld [vmem:[#allocation6 + $0x28] sm:$0xf0] }
  0x6f   : > { %v518_v12 = vsel %vm517_vm0, %v2699_v1, %v516_v10  ;;  %v2270_v1 = vor.u32 %v2501_v63, %v2269_v62  ;;  %v2258_v10 = vor.u32 %v2498_v8, %v2257_v7  ;;  %v2226_v50 = vor.u32 %v2488_v45, %v2223_v46  ;;  %v2209_v52 = vld [vmem:[#allocation6] sm:$0xf]  ;;  %v2486_v53 = vld [vmem:[#allocation6 + $0x8] sm:$0xf0]  ;;  %v2485_v54 = vld [vmem:[#allocation6 + $0x4] sm:$0xf] }
  0x70   : > { %v519_v15 = vmul.f32 %v518_v12, %v505_v13  ;;  %v520_v32 = vmul.f32 %v518_v12, %v511_v30  ;;  %v3347_v33 = vsel %vm545_vm2, %v2701_v19, %v544_v29  ;;  %v2265_v12 = vld [vmem:[#allocation6 + $0x68] sm:$0xf]  ;;  %v2499_v13 = vld [vmem:[#allocation6 + $0x70] sm:$0xf0]  ;;  %v2230_v51 = vor.u32 %v2490_v48, %v2229_v47  ;;  %v2211_v56 = vld [vmem:[#allocation6 + $0xc] sm:$0xf0] }
  0x71   : > { %813 = vmatpush.bf16.msra.mxu0 %v2270_v1  ;;  %v2495_v19 = vld [vmem:[#allocation6 + $0x50] sm:$0xf0]  ;;  %v2217_v57 = vld [vmem:[#allocation6 + $0x8] sm:$0xf]  ;;  %v2210_v63 = vor.u32 %v2486_v53, %v2209_v52  ;;  %v2214_v0 = vor.u32 %v2485_v54, %v2211_v56  ;;  %vm1186_vm0 = vcmask 523264   ;;  %p490_p1 = scmp.lt.s32.totalorder %s2204_s30, 3 }
  0x72   : > { %v3339_v16 = vsel %vm527_vm1, %v519_v15, %v523_v14  ;;  %v3350_v34 = vsel %vm527_vm1, %v520_v32, %v524_v31  ;;  %v2262_v14 = vor.u32 %v2497_v9, %v2259_v11  ;;  %v2266_v15 = vor.u32 %v2499_v13, %v2265_v12  ;;  %v2491_v29 = vld [vmem:[#allocation6 + $0x34] sm:$0xf]  ;;  %v2235_v31 = vld [vmem:[#allocation6 + $0x3c] sm:$0xf0]  ;;  %v2241_v32 = vld [vmem:[#allocation6 + $0x38] sm:$0xf] }
  0x73   : > { %532 = vadd.xlane.f32.xlu0 %v3339_v16  ;;  %536 = vadd.xlane.f32.xlu2 %v3350_v34  ;;  %v2246_v24 = vor.u32 %v2495_v19, %v2245_v18  ;;  %v2487_v58 = vld [vmem:[#allocation6 + $0x10] sm:$0xf0]  ;;  %vm1189_vm1 = vcmask 785408   ;;  %s3759_s30 = smov (!%p490_p1, %s2204_s30), 3 }
  0x74   : > { %833 = vmatpush.bf16.msra.mxu1 %v2262_v14  ;;  %852 = vmatpush.bf16.msra.mxu2 %v2266_v15  ;;  %v2218_v1 = vor.u32 %v2487_v58, %v2217_v57  ;;  %s2484_s25 = sshll.u32 %s3759_s30, 4 }
  0x75   : > { %814 = vmatpush.bf16.msra.mxu0 %v2258_v10  ;;  %s494_s20 = scalar_lea.vmem %s3735_s9, %s2484_s25 }
  0x78   : > { %834 = vmatpush.bf16.msra.mxu1 %v2250_v25  ;;  %853 = vmatpush.bf16.msra.mxu2 %v2254_v26 }
  0x79   : > { %815 = vmatpush.bf16.msra.mxu0 %v2246_v24 }
  0x7b   : > { %534 = vadd.xlane.f32.xlu0 %v3343_v17  ;;  %538 = vadd.xlane.f32.xlu2 %v3358_v38 }
  0xe6   : > { %v533_v35 = vpop.xlane.xlu0 %532  ;;  %v537_v61 = vpop.xlane.xlu2 %536 }
  0xe7   : > { %v547_v36 = vmul.f32 %v3347_v33, %v533_v35  ;;  %v2493_v35 = vld [vmem:[#allocation6 + $0x40] sm:$0xf0]  ;;  %v549_v9 = vmul.f32 %v3347_v33, %v537_v61 }
  0xe9   : > { %v3355_v37 = vsub.f32 %v3339_v16, %v547_v36  ;;  %v3377_v13 = vsub.f32 %v3350_v34, %v549_v9 }
  0xeb   : > { %v555_v39 = vmul.f32 %v3355_v37, %v3355_v37  ;;  %v557_v20 = vmul.f32 %v3377_v13, %v3377_v13 }
  0xed   : > { %559 = vadd.xlane.f32.xlu1 %v555_v39  ;;  %v2234_v39 = vor.u32 %v2492_v28, %v2233_v27  ;;  %563 = vadd.xlane.f32.xlu0 %v557_v20 }
  0xee   : > { %v535_v40 = vpop.xlane.xlu0 %534  ;;  %v539_v6 = vpop.xlane.xlu2 %538 }
  0xef   : > { %v548_v41 = vmul.f32 %v3347_v33, %v535_v40  ;;  %v2238_v40 = vor.u32 %v2491_v29, %v2235_v31  ;;  %816 = vmatpush.bf16.msra.mxu0 %v2234_v39  ;;  %v550_v10 = vmul.f32 %v3347_v33, %v539_v6 }
  0xf1   : > { %v3365_v42 = vsub.f32 %v3343_v17, %v548_v41  ;;  %v2242_v41 = vor.u32 %v2493_v35, %v2241_v32  ;;  %835 = vmatpush.bf16.msra.mxu1 %v2238_v40  ;;  %v3380_v14 = vsub.f32 %v3358_v38, %v550_v10  ;;  %v497_v32 = vld [vmem:[#allocation13] sm:$0x3f] }
  0xf3   : > { %v556_v43 = vmul.f32 %v3365_v42, %v3365_v42  ;;  %854 = vmatpush.bf16.msra.mxu2 %v2242_v41  ;;  %v558_v21 = vmul.f32 %v3380_v14, %v3380_v14 }
  0xf5   : > { %561 = vadd.xlane.f32.xlu1 %v556_v43  ;;  %v2221_v43 = vld [vmem:[#allocation6 + $0x18] sm:$0xf]  ;;  %836 = vmatpush.bf16.msra.mxu1 %v2226_v50 }
  0xf6   : > { %v2222_v49 = vor.u32 %v2489_v44, %v2221_v43  ;;  %v636_v43 = vperm.slane %v497_v32, 1 }
  0xf7   : > { %855 = vmatpush.bf16.msra.mxu2 %v2230_v51 }
  0xf8   : > { %817 = vmatpush.bf16.msra.mxu0 %v2222_v49 }
  0xf9   : > { %837 = vmatpush.bf16.msra.mxu1 %v2214_v0 }
  0xfb   : > { %856 = vmatpush.bf16.msra.mxu2 %v2218_v1 }
  0xfc   : > { %818 = vmatpush.bf16.msra.mxu0 %v2210_v63 }
  0xfd   : > { %565 = vadd.xlane.f32.xlu1 %v558_v21 }
 0x160   : > { %v560_v30 = vpop.xlane.xlu1 %559  ;;  %v564_v49 = vpop.xlane.xlu0 %563 }
 0x161   : > { %v3369_v36 = vmul.f32 0.007874016, %v560_v30  ;;  %v569_v51 = vmul.f32 0.007874016, %v564_v49 }
 0x163   : > { %2702 = vrsqrt.f32 %v3369_v36  ;;  %vm578_vm3 = vcmp.eq.f32.partialorder %v3369_v36, inf  ;;  %vm580_vm4 = vcmp.eq.f32.partialorder %v3369_v36, 0.0  ;;  %v581_v15 = vand.u32 2147483648, %v3369_v36 }
 0x164   : > { %vm602_vm7 = vcmp.eq.f32.partialorder %v569_v51, inf  ;;  %v605_v0 = vand.u32 2147483648, %v569_v51  ;;  %vm604_vm9 = vcmp.eq.f32.partialorder %v569_v51, 0.0 }
 0x168   : > { %v562_v55 = vpop.xlane.xlu1 %561 }
 0x169   : > { %v2703_v59 = vpop.eup %2702  ;;  %v568_v60 = vmul.f32 0.007874016, %v562_v55 }
 0x16a   : > { %v572_v62 = vmul.f32 %v2703_v59, %v3369_v36 }
 0x16b   : > { %2704 = vrsqrt.f32 %v568_v60  ;;  %vm590_vm5 = vcmp.eq.f32.partialorder %v568_v60, inf  ;;  %v593_v27 = vand.u32 2147483648, %v568_v60  ;;  %vm592_vm6 = vcmp.eq.f32.partialorder %v568_v60, 0.0 }
 0x16c   : > { %v573_v2 = vmul.f32 %v2703_v59, %v572_v62 }
 0x16e   : > { %v574_v3 = vmul.f32 0.5, %v573_v2 }
 0x170   : > { %v575_v4 = vsub.f32 1.5, %v574_v3  ;;  %v566_v48 = vpop.xlane.xlu1 %565 }
 0x171   : > { %v2705_v5 = vpop.eup %2704  ;;  %v570_v50 = vmul.f32 0.007874016, %v566_v48 }
 0x172   : > { %v584_v7 = vmul.f32 %v2705_v5, %v568_v60  ;;  %v576_v8 = vmul.f32 %v2703_v59, %v575_v4 }
 0x173   : > { %vm614_vm8 = vcmp.eq.f32.partialorder %v570_v50, inf  ;;  %vm616_vm10 = vcmp.eq.f32.partialorder %v570_v50, 0.0  ;;  %v617_v2 = vand.u32 2147483648, %v570_v50 }
 0x174   : > { %v585_v11 = vmul.f32 %v2705_v5, %v584_v7  ;;  %v577_v12 = vmul.f32 %v576_v8, %v3369_v36 }
 0x176   : > { %v586_v18 = vmul.f32 0.5, %v585_v11  ;;  %v579_v19 = vsel %vm578_vm3, %v3369_v36, %v577_v12  ;;  %v631_v36 = vperm.slane %v497_v32, 0 }
 0x177   : > { %v582_v22 = vsel %vm580_vm4, %v581_v15, %v579_v19 }
 0x178   : > { %v587_v23 = vsub.f32 1.5, %v586_v18  ;;  %v619_v24 = vadd.f32 1e-06, %v582_v22  ;;  %v675_v18 = vld [vmem:[#allocation7] sm:$0x7] }
 0x17a   : > { %v588_v25 = vmul.f32 %v2705_v5, %v587_v23  ;;  %2706 = vrcp.f32 %v619_v24  ;;  %v678_v23 = vperm.slane %v675_v18, 1 }
 0x17c   : > { %v589_v26 = vmul.f32 %v588_v25, %v568_v60 }
 0x17e   : > { %v591_v28 = vsel %vm590_vm5, %v568_v60, %v589_v26 }
 0x17f   : > { %v594_v29 = vsel %vm592_vm6, %v593_v27, %v591_v28 }
 0x180   : > { %v620_v30 = vadd.f32 1e-06, %v594_v29  ;;  %v2707_v31 = vpop.eup %2706  ;;  %v3396_v29 = vperm.slane %v675_v18, 2 }
 0x181   : > { %v627_v35 = vmul.f32 %v2707_v31, %v3355_v37 }
 0x182   : > { %2708 = vrcp.f32 %v620_v30  ;;  %v677_v30 = vperm.slane %v675_v18, 0 }
 0x183   : > { %v632_v41 = vmul.f32 %v631_v36, %v627_v35  ;;  %2710 = vrsqrt.f32 %v570_v50 }
 0x184   : > { %2712 = vrsqrt.f32 %v569_v51 }
 0x185   : > { %v637_v45 = vadd.f32 %v636_v43, %v632_v41 }
 0x188   : > { %v2709_v39 = vpop.eup %2708 }
 0x189   : > { %v628_v40 = vmul.f32 %v2709_v39, %v3365_v42  ;;  %v2711_v37 = vpop.eup %2710 }
 0x18a   : > { %v2713_v52 = vpop.eup %2712  ;;  %v608_v53 = vmul.f32 %v2711_v37, %v570_v50 }
 0x18b   : > { %v633_v44 = vmul.f32 %v631_v36, %v628_v40  ;;  %v596_v54 = vmul.f32 %v2713_v52, %v569_v51 }
 0x18c   : > { %v609_v42 = vmul.f32 %v2711_v37, %v608_v53 }
 0x18d   : > { %v638_v46 = vadd.f32 %v636_v43, %v633_v44  ;;  %v597_v55 = vmul.f32 %v2713_v52, %v596_v54 }
 0x18e   : > { %v610_v56 = vmul.f32 0.5, %v609_v42 }
 0x18f   : > { %v641_v47 = vpack.c.bf16 %v638_v46, %v637_v45  ;;  %v598_v57 = vmul.f32 0.5, %v597_v55  ;;  %v868_v46 = vld [vmem:[%s3315_s18] sm:$0x1] }
 0x190   : > { %v611_v58 = vsub.f32 1.5, %v610_v56  ;;  %vm870_vm12 = vcmp.eq.f32.partialorder %v868_v46, 0.0 }
 0x191   : > { %819 = vmatmul.bf16.vlgmr.msra.gmra.mxu0 %v641_v47  ;;  %838 = vmatmul.bf16.vlgmr.msra.gmra.mxu1 %v641_v47  ;;  %v599_v59 = vsub.f32 1.5, %v598_v57 }
 0x192   : > { %857 = vmatmul.bf16.vlgmr.msra.gmra.mxu2 %v641_v47  ;;  %v612_v60 = vmul.f32 %v2711_v37, %v611_v58 }
 0x193   : > { %v600_v61 = vmul.f32 %v2713_v52, %v599_v59 }
 0x194   : > { %v613_v62 = vmul.f32 %v612_v60, %v570_v50 }
 0x195   : > { %v601_v63 = vmul.f32 %v600_v61, %v569_v51 }
 0x196   : > { %v615_v1 = vsel %vm614_vm8, %v570_v50, %v613_v62 }
 0x197   : > { %v603_v3 = vsel %vm602_vm7, %v569_v51, %v601_v63  ;;  %v618_v5 = vsel %vm616_vm10, %v617_v2, %v615_v1  ;;  %v3111_v51 = vmov 0.0  }
 0x198   : > { %v606_v4 = vsel %vm604_vm9, %v605_v0, %v603_v3  ;;  %v622_v7 = vadd.f32 1e-06, %v618_v5  ;;  %v871_v37 = vsel %vm870_vm12, -1e+09, %v3111_v51 }
 0x199   : > { %v621_v6 = vadd.f32 1e-06, %v606_v4  ;;  %v873_v42 = vsel %vm872_vm13, %v871_v37, -1e+09 }
 0x19a   : > { %v3410_v57 = vperm.slane %v873_v42, 0 }
 0x19b   : > { %2714 = vrcp.f32 %v621_v6 }
 0x19c   : > { %2716 = vrcp.f32 %v622_v7 }
 0x1a1   : > { %v2715_v8 = vpop.eup %2714 }
 0x1a2   : > { %v2717_v9 = vpop.eup %2716  ;;  %v629_v10 = vmul.f32 %v2715_v8, %v3377_v13 }
 0x1a3   : > { %v630_v12 = vmul.f32 %v2717_v9, %v3380_v14 }
 0x1a4   : > { %v634_v15 = vmul.f32 %v631_v36, %v629_v10 }
 0x1a5   : > { %v635_v20 = vmul.f32 %v631_v36, %v630_v12 }
 0x1a6   : > { %v639_v21 = vadd.f32 %v636_v43, %v634_v15 }
 0x1a7   : > { %v640_v22 = vadd.f32 %v636_v43, %v635_v20 }
 0x1a9   : > { %v642_v24 = vpack.c.bf16 %v640_v22, %v639_v21 }
 0x1ab   : > { %843 = vmatmul.bf16.gmra.mxu1 %v642_v24  ;;  %824 = vmatmul.bf16.gmra.mxu0 %v642_v24 }
 0x1ac   : > { %862 = vmatmul.bf16.gmra.mxu2 %v642_v24 }
 0x20e   : > { %v839_v11 = vpop.f32.mrf.mxu1  ;;  %v820_v19 = vpop.f32.mrf.mxu0 }
 0x20f   : > { %v840_v27 = vadd.f32 %v839_v11, %v678_v23  ;;  %v821_v40 = vadd.f32 %v820_v19, %v677_v30 }
 0x215   : > { %v858_v25 = vpop.f32.mrf.mxu2 }
 0x216   : > { %v841_v26 = vpop.f32.mrf.mxu1  ;;  %v822_v14 = vpop.f32.mrf.mxu0  ;;  %v859_v36 = vadd.f32 %v858_v25, %v3396_v29 }
 0x217   : > { %v842_v28 = vadd.f32 %v841_v26, %v678_v23  ;;  %v823_v32 = vadd.f32 %v822_v14, %v677_v30 }
 0x219   : > { %v3394_v13 = vpack.c.bf16 %v842_v28, %v840_v27  ;;  %v874_v43 = vpack.c.bf16 %v823_v32, %v821_v40 }
 0x21b   : > { %v882_v31 = vsel %vm877_vm11, %v3394_v13, 0 }
 0x21c   : > { %891 = vmatpush.bf16.xpose.msra.mxu3 %v882_v31 }
 0x21d   : > { %v860_v35 = vpop.f32.mrf.mxu2 }
 0x21e   : > { %v861_v39 = vadd.f32 %v860_v35, %v3396_v29 }
 0x220   : > { %v3402_v41 = vpack.c.bf16 %v861_v39, %v859_v36 }
 0x223   : > { %2303 = vmatmul.msk.bf16.vlgmr.msra.gmra.mxu3 %vm877_vm11, %v874_v43 }
 0x224   : > { %937 = vmatpush.bf16.msrb.mxu3 %v3402_v41 }
 0x228   : > { %v844_v44 = vpop.f32.mrf.mxu1  ;;  %v825_v45 = vpop.f32.mrf.mxu0 }
 0x229   : > { %v845_v47 = vadd.f32 %v844_v44, %v678_v23  ;;  %v826_v52 = vadd.f32 %v825_v45, %v677_v30 }
 0x22f   : > { %v3447_v46 = vpop.f32.mrf.mxu2 }
 0x230   : > { %v846_v48 = vpop.f32.mrf.mxu1  ;;  %v827_v54 = vpop.f32.mrf.mxu0 }
 0x231   : > { %v847_v49 = vadd.f32 %v846_v48, %v678_v23  ;;  %v828_v55 = vadd.f32 %v827_v54, %v677_v30  ;;  %v869_v54 = vld [vmem:[%s3315_s18 + $0x1] sm:$0x1] }
 0x232   : > { %vm1192_vm15 = vcmp.eq.f32.partialorder %v869_v54, 0.0 }
 0x233   : > { %v1196_v50 = vpack.c.bf16 %v847_v49, %v845_v47  ;;  %v1195_v56 = vpack.c.bf16 %v828_v55, %v826_v52 }
 0x235   : > { %v1202_v53 = vsel %vm877_vm11, %v1196_v50, 0 }
 0x236   : > { %1211 = vmatpush.bf16.xpose.msrb.mxu0 %v1202_v53 }
 0x237   : > { %v3449_v47 = vpop.f32.mrf.mxu2 }
 0x23d   : > { %2311 = vmatmul.msk.bf16.vlgmr.msrb.gmra.mxu0 %vm877_vm11, %v1195_v56 }
 0x2a6   : > { %v893_v58 = vpop.f32.mrf.mxu3 }
 0x2a7   : > { %v898_v59 = vmul.f32 0.17677669, %v893_v58 }
 0x2a9   : > { %v901_v60 = vadd.f32 %v3410_v57, %v898_v59 }
 0x2ab   : > { %v904_v61 = vsel %vm903_vm14, %v901_v60, -inf }
 0x2ac   : > { %905 = vmax.xlane.f32.xlu2 %v904_v61  ;;  %v1193_v61 = vsel %vm1192_vm15, -1e+09, %v3111_v51 }
 0x2ae   : > { %v895_v62 = vpop.f32.mrf.mxu3 }
 0x2af   : > { %v899_v63 = vmul.f32 0.17677669, %v895_v62 }
 0x2b1   : > { %v902_v0 = vadd.f32 %v3410_v57, %v899_v63 }
 0x2b3   : > { %v907_v1 = vsel %vm903_vm14, %v902_v0, -inf }
 0x2b4   : > { %908 = vmax.xlane.f32.xlu0 %v907_v1 }
 0x2ba   : > { %v1213_v48 = vpop.f32.mrf.mxu0 }
 0x2c2   : > { %v1215_v62 = vpop.f32.mrf.mxu0 }
 0x2c8   : > { %948 = vrot.lane.b32.xlu0 %v3394_v13, %s3112_s17 }
 0x2d0   : > { %1089 = vrot.lane.b32.xlu0 %v874_v43, %s3113_s27 }
 0x2d8   : > { %1018 = vrot.lane.b32.xlu0 %v874_v43, %s3114_s2 }
 0x2e0   : > { %1408 = vrot.lane.b32.xlu0 %v1195_v56, %s3113_s27 }
 0x31f   : > { %v906_v2 = vpop.xlane.xlu2 %905 }
 0x320   : > { %v910_v3 = vsub.f32 %v901_v60, %v906_v2  ;;  %v1194_v2 = vsel %vm872_vm13, %v1193_v61, -1e+09 }
 0x322   : > { %v912_v4 = vmul.f32 1.442695, %v910_v3 }
 0x324   : > { %2718 = vpow2.f32 %v912_v4 }
 0x327   : > { %v909_v5 = vpop.xlane.xlu0 %908 }
 0x328   : > { %v911_v6 = vsub.f32 %v902_v0, %v909_v5 }
 0x32a   : > { %v2719_v7 = vpop.eup %2718  ;;  %v914_v8 = vmul.f32 1.442695, %v911_v6  ;;  %v1218_v6 = vmul.f32 0.17677669, %v1213_v48 }
 0x32b   : > { %v916_v9 = vsel %vm903_vm14, %v2719_v7, 0.0 }
 0x32c   : > { %2720 = vpow2.f32 %v914_v8  ;;  %917 = vadd.xlane.f32.xlu1 %v916_v9 }
 0x332   : > { %v2721_v10 = vpop.eup %2720 }
 0x333   : > { %v919_v11 = vsel %vm903_vm14, %v2721_v10, 0.0 }
 0x334   : > { %920 = vadd.xlane.f32.xlu2 %v919_v11 }
 0x33a   : > { %v949_v12 = vpop.permute.xlu0 %948 }
 0x33b   : > { %v954_v15 = vsel %vm877_vm11, %v949_v12, 0 }
 0x33c   : > { %963 = vmatpush.bf16.xpose.msra.mxu3 %v954_v15  ;;  %v1219_v15 = vmul.f32 0.17677669, %v1215_v62 }
 0x342   : > { %v1090_v27 = vpop.permute.xlu0 %1089 }
 0x345   : > { %945 = vrot.lane.b32.xlu1 %v874_v43, %s3112_s17 }
 0x34a   : > { %v1019_v30 = vpop.permute.xlu0 %1018 }
 0x34c   : > { %1091 = vrot.lane.b32.xlu2 %v3394_v13, %s3113_s27 }
 0x34d   : > { %1267 = vrot.lane.b32.xlu1 %v1196_v50, %s3112_s17 }
 0x352   : > { %v1409_v45 = vpop.permute.xlu0 %1408 }
 0x354   : > { %1020 = vrot.lane.b32.xlu2 %v3394_v13, %s3114_s2 }
 0x355   : > { %1410 = vrot.lane.b32.xlu1 %v1196_v50, %s3113_s27 }
 0x35c   : > { %1264 = vrot.lane.b32.xlu2 %v1195_v56, %s3112_s17 }
 0x35d   : > { %1337 = vrot.lane.b32.xlu1 %v1195_v56, %s3114_s2 }
 0x364   : > { %1339 = vrot.lane.b32.xlu2 %v1196_v50, %s3114_s2 }
 0x39f   : > { %v918_v18 = vpop.xlane.xlu1 %917 }
 0x3a0   : > { %2722 = vrcp.f32 %v918_v18 }
 0x3a6   : > { %v2723_v20 = vpop.eup %2722 }
 0x3a7   : > { %v921_v19 = vpop.xlane.xlu2 %920  ;;  %v924_v22 = vmul.f32 %v2723_v20, %v2719_v7  ;;  %v1220_v7 = vperm.slane %v1194_v2, 0 }
 0x3a8   : > { %2724 = vrcp.f32 %v921_v19 }
 0x3a9   : > { %v3480_v12 = vadd.f32 %v1220_v7, %v1218_v6 }
 0x3ab   : > { %v1223_v20 = vsel %vm903_vm14, %v3480_v12, -inf }
 0x3ae   : > { %v2725_v21 = vpop.eup %2724 }
 0x3af   : > { %v925_v23 = vmul.f32 %v2725_v21, %v2721_v10  ;;  %v1092_v24 = vpop.permute.xlu2 %1091 }
 0x3b0   : > { %v1097_v25 = vsel %vm877_vm11, %v1092_v24, 0  ;;  %v3486_v24 = vadd.f32 %v1220_v7, %v1219_v15 }
 0x3b1   : > { %1106 = vmatpush.bf16.xpose.msrb.mxu2 %v1097_v25  ;;  %v926_v26 = vpack.c.bf16 %v925_v23, %v924_v22 }
 0x3b3   : > { %2304 = vmatmul.msk.bf16.vlgmr.msrb.gmra.mxu3 %vm903_vm14, %v926_v26 }
 0x3b7   : > { %v946_v28 = vpop.permute.xlu1 %945  ;;  %v1021_v13 = vpop.permute.xlu2 %1020 }
 0x3b8   : > { %2309 = vmatmul.msk.bf16.vlgmr.msrb.gmra.mxu2 %vm877_vm11, %v1090_v27  ;;  %v1026_v14 = vsel %vm877_vm11, %v1021_v13, 0  ;;  %v1226_v13 = vsel %vm903_vm14, %v3486_v24, -inf }
 0x3b9   : > { %1035 = vmatpush.bf16.xpose.msrb.mxu1 %v1026_v14 }
 0x3bf   : > { %v1268_v31 = vpop.permute.xlu1 %1267  ;;  %v1265_v32 = vpop.permute.xlu2 %1264 }
 0x3c0   : > { %v1273_v35 = vsel %vm877_vm11, %v1268_v31, 0  ;;  %2307 = vmatmul.msk.bf16.vlgmr.msrb.gmra.mxu1 %vm877_vm11, %v1019_v30 }
 0x3c1   : > { %1282 = vmatpush.bf16.xpose.msra.mxu2 %v1273_v35 }
 0x3c3   : > { %2305 = vmatmul.msk.bf16.vlgmr.msra.gmra.mxu3 %vm877_vm11, %v946_v28 }
 0x3c7   : > { %v1411_v36 = vpop.permute.xlu1 %1410  ;;  %v1340_v39 = vpop.permute.xlu2 %1339 }
 0x3c8   : > { %v1416_v40 = vsel %vm877_vm11, %v1411_v36, 0  ;;  %v1345_v43 = vsel %vm877_vm11, %v1340_v39, 0  ;;  %2313 = vmatmul.msk.bf16.vlgmr.msra.gmra.mxu2 %vm877_vm11, %v1265_v32 }
 0x3c9   : > { %1354 = vmatpush.bf16.xpose.msra.mxu0 %v1345_v43  ;;  %1425 = vmatpush.bf16.xpose.msrb.mxu2 %v1416_v40 }
 0x3cf   : > { %v1338_v44 = vpop.permute.xlu1 %1337 }
 0x3d0   : > { %2315 = vmatmul.msk.bf16.vlgmr.msra.gmra.mxu0 %vm877_vm11, %v1338_v44 }
 0x3d8   : > { %2317 = vmatmul.msk.bf16.vlgmr.msrb.gmra.mxu2 %vm877_vm11, %v1409_v45 }
 0x436   : > { %v3455_v42 = vpop.f32.mrf.mxu3 }
 0x43b   : > { %v1108_v49 = vpop.f32.mrf.mxu2 }
 0x43c   : > { %v1113_v50 = vmul.f32 0.17677669, %v1108_v49 }
 0x43d   : > { %v1037_v37 = vpop.f32.mrf.mxu1 }
 0x43e   : > { %v1042_v52 = vmul.f32 0.17677669, %v1037_v37  ;;  %v3452_v53 = vadd.f32 %v1113_v50, %v3410_v57  ;;  %v3474_v5 = vpop.f32.mrf.mxu3 }
 0x440   : > { %v1117_v55 = vsel %vm903_vm14, %v3452_v53, -inf  ;;  %v3460_v56 = vadd.f32 %v1042_v52, %v3410_v57 }
 0x441   : > { %1118 = vmax.xlane.f32.xlu1 %v1117_v55 }
 0x442   : > { %v1046_v58 = vsel %vm903_vm14, %v3460_v56, -inf }
 0x443   : > { %v1110_v59 = vpop.f32.mrf.mxu2  ;;  %1047 = vmax.xlane.f32.xlu2 %v1046_v58 }
 0x444   : > { %v1114_v60 = vmul.f32 0.17677669, %v1110_v59 }
 0x445   : > { %v1039_v63 = vpop.f32.mrf.mxu1 }
 0x446   : > { %v1043_v0 = vmul.f32 0.17677669, %v1039_v63  ;;  %v3466_v1 = vadd.f32 %v1114_v60, %v3410_v57  ;;  %v965_v21 = vpop.f32.mrf.mxu3 }
 0x447   : > { %v970_v40 = vmul.f32 0.17677669, %v965_v21 }
 0x448   : > { %v1120_v3 = vsel %vm903_vm14, %v3466_v1, -inf  ;;  %v3472_v4 = vadd.f32 %v1043_v0, %v3410_v57 }
 0x449   : > { %1121 = vmax.xlane.f32.xlu0 %v1120_v3  ;;  %v3507_v50 = vadd.f32 %v970_v40, %v3410_v57 }
 0x44a   : > { %v1049_v51 = vsel %vm903_vm14, %v3472_v4, -inf }
 0x44b   : > { %v1284_v8 = vpop.f32.mrf.mxu2  ;;  %1050 = vmax.xlane.f32.xlu1 %v1049_v51  ;;  %v974_v54 = vsel %vm903_vm14, %v3507_v50, -inf }
 0x44c   : > { %v1289_v9 = vmul.f32 0.17677669, %v1284_v8 }
 0x44d   : > { %v1356_v10 = vpop.f32.mrf.mxu0 }
 0x44e   : > { %v3478_v11 = vadd.f32 %v1289_v9, %v1220_v7  ;;  %v1361_v19 = vmul.f32 0.17677669, %v1356_v10  ;;  %v967_v36 = vpop.f32.mrf.mxu3 }
 0x44f   : > { %v971_v43 = vmul.f32 0.17677669, %v967_v36 }
 0x450   : > { %v1293_v18 = vsel %vm903_vm14, %v3478_v11, -inf  ;;  %v3490_v27 = vadd.f32 %v1361_v19, %v1220_v7 }
 0x451   : > { %1294 = vmax.xlane.f32.xlu0 %v1293_v18  ;;  %v973_v37 = vadd.f32 %v971_v43, %v3410_v57 }
 0x452   : > { %v1365_v30 = vsel %vm903_vm14, %v3490_v27, -inf }
 0x453   : > { %v1286_v22 = vpop.f32.mrf.mxu2  ;;  %1224 = vmax.xlane.f32.xlu1 %v1223_v20  ;;  %v977_v55 = vsel %vm903_vm14, %v973_v37, -inf }
 0x454   : > { %v1290_v23 = vmul.f32 0.17677669, %v1286_v22 }
 0x455   : > { %v1358_v25 = vpop.f32.mrf.mxu0 }
 0x456   : > { %v3488_v26 = vadd.f32 %v1290_v23, %v1220_v7  ;;  %v1362_v28 = vmul.f32 0.17677669, %v1358_v25 }
 0x458   : > { %v1296_v14 = vsel %vm903_vm14, %v3488_v26, -inf  ;;  %v3498_v35 = vadd.f32 %v1362_v28, %v1220_v7 }
 0x459   : > { %1227 = vmax.xlane.f32.xlu0 %v1226_v13  ;;  %1297 = vmax.xlane.f32.xlu2 %v1296_v14 }
 0x45a   : > { %v1368_v44 = vsel %vm903_vm14, %v3498_v35, -inf }
 0x45b   : > { %1366 = vmax.xlane.f32.xlu1 %v1365_v30  ;;  %v1427_v31 = vpop.f32.mrf.mxu2 }
 0x45c   : > { %v1432_v32 = vmul.f32 0.17677669, %v1427_v31 }
 0x45e   : > { %v3500_v39 = vadd.f32 %v1432_v32, %v1220_v7 }
 0x460   : > { %v1436_v45 = vsel %vm903_vm14, %v3500_v39, -inf }
 0x461   : > { %1369 = vmax.xlane.f32.xlu0 %v1368_v44  ;;  %1437 = vmax.xlane.f32.xlu2 %v1436_v45 }
 0x463   : > { %v1429_v48 = vpop.f32.mrf.mxu2 }
 0x464   : > { %v1433_v49 = vmul.f32 0.17677669, %v1429_v48 }
 0x466   : > { %v3510_v52 = vadd.f32 %v1433_v49, %v1220_v7 }
 0x468   : > { %v1439_v58 = vsel %vm903_vm14, %v3510_v52, -inf }
 0x469   : > { %975 = vmax.xlane.f32.xlu0 %v974_v54  ;;  %978 = vmax.xlane.f32.xlu2 %v977_v55  ;;  %v864_v54 = vadd.f32 %v3447_v46, %v3396_v29  ;;  %v866_v55 = vadd.f32 %v3449_v47, %v3396_v29 }
 0x46a   : > { %1440 = vmax.xlane.f32.xlu1 %v1439_v58 }
 0x481   : > { %998 = vrot.lane.b32.xlu2 %v3402_v41, %s3112_s17 }
 0x4b4   : > { %v1119_v59 = vpop.xlane.xlu1 %1118 }
 0x4b5   : > { %v1123_v60 = vsub.f32 %v3452_v53, %v1119_v59  ;;  %v3563_v59 = vpack.c.bf16 %v866_v55, %v864_v54 }
 0x4b6   : > { %v1048_v57 = vpop.xlane.xlu2 %1047 }
 0x4b7   : > { %v1125_v61 = vmul.f32 1.442695, %v1123_v60  ;;  %v1052_v62 = vsub.f32 %v3460_v56, %v1048_v57 }
 0x4b9   : > { %2726 = vpow2.f32 %v1125_v61  ;;  %v1054_v63 = vmul.f32 1.442695, %v1052_v62 }
 0x4bb   : > { %2728 = vpow2.f32 %v1054_v63 }
 0x4bc   : > { %v1122_v0 = vpop.xlane.xlu0 %1121 }
 0x4bd   : > { %v1124_v2 = vsub.f32 %v3466_v1, %v1122_v0 }
 0x4be   : > { %v1051_v3 = vpop.xlane.xlu1 %1050 }
 0x4bf   : > { %v3522_v6 = vpop.eup %2726  ;;  %v1127_v51 = vmul.f32 1.442695, %v1124_v2  ;;  %v1053_v7 = vsub.f32 %v3472_v4, %v1051_v3 }
 0x4c0   : > { %v1129_v8 = vsel %vm903_vm14, %v3522_v6, 0.0 }
 0x4c1   : > { %2730 = vpow2.f32 %v1127_v51  ;;  %1130 = vadd.xlane.f32.xlu1 %v1129_v8  ;;  %v1056_v53 = vmul.f32 1.442695, %v1053_v7  ;;  %v3527_v56 = vpop.eup %2728 }
 0x4c2   : > { %v1058_v18 = vsel %vm903_vm14, %v3527_v56, 0.0 }
 0x4c3   : > { %2732 = vpow2.f32 %v1056_v53 }
 0x4c4   : > { %v1295_v9 = vpop.xlane.xlu0 %1294 }
 0x4c5   : > { %v1299_v10 = vsub.f32 %v3478_v11, %v1295_v9 }
 0x4c6   : > { %v1225_v44 = vpop.xlane.xlu1 %1224 }
 0x4c7   : > { %v3530_v15 = vpop.eup %2730  ;;  %v1301_v1 = vmul.f32 1.442695, %v1299_v10  ;;  %v1229_v49 = vsub.f32 %v3480_v12, %v1225_v44 }
 0x4c8   : > { %v1132_v4 = vsel %vm903_vm14, %v3530_v15, 0.0 }
 0x4c9   : > { %2734 = vpow2.f32 %v1301_v1  ;;  %1059 = vadd.xlane.f32.xlu1 %v1058_v18  ;;  %1133 = vadd.xlane.f32.xlu0 %v1132_v4  ;;  %v3536_v21 = vpop.eup %2732  ;;  %v1231_v58 = vmul.f32 1.442695, %v1229_v49 }
 0x4ca   : > { %v1061_v25 = vsel %vm903_vm14, %v3536_v21, 0.0 }
 0x4cc   : > { %v1298_v19 = vpop.xlane.xlu2 %1297  ;;  %v1228_v20 = vpop.xlane.xlu0 %1227 }
 0x4cd   : > { %v1230_v22 = vsub.f32 %v3486_v24, %v1228_v20  ;;  %v1300_v61 = vsub.f32 %v3488_v26, %v1298_v19 }
 0x4ce   : > { %v1367_v48 = vpop.xlane.xlu1 %1366 }
 0x4cf   : > { %v3539_v11 = vpop.eup %2734  ;;  %v1233_v23 = vmul.f32 1.442695, %v1230_v22  ;;  %v1303_v29 = vmul.f32 1.442695, %v1300_v61  ;;  %v1371_v7 = vsub.f32 %v3490_v27, %v1367_v48 }
 0x4d0   : > { %v1305_v28 = vsel %vm903_vm14, %v3539_v11, 0.0 }
 0x4d1   : > { %1062 = vadd.xlane.f32.xlu0 %v1061_v25  ;;  %1306 = vadd.xlane.f32.xlu2 %v1305_v28  ;;  %2736 = vpow2.f32 %v1233_v23  ;;  %v1373_v53 = vmul.f32 1.442695, %v1371_v7 }
 0x4d4   : > { %v1438_v13 = vpop.xlane.xlu2 %1437  ;;  %v1370_v45 = vpop.xlane.xlu0 %1369 }
 0x4d5   : > { %v1372_v47 = vsub.f32 %v3498_v35, %v1370_v45  ;;  %v1442_v26 = vsub.f32 %v3500_v39, %v1438_v13 }
 0x4d7   : > { %v3545_v14 = vpop.eup %2736  ;;  %v1444_v3 = vmul.f32 1.442695, %v1442_v26 }
 0x4d8   : > { %v1238_v30 = vsel %vm903_vm14, %v3545_v14, 0.0 }
 0x4d9   : > { %1239 = vadd.xlane.f32.xlu2 %v1238_v30 }
 0x4dc   : > { %v979_v24 = vpop.xlane.xlu2 %978 }
 0x4dd   : > { %v981_v31 = vsub.f32 %v973_v37, %v979_v24  ;;  %v976_v37 = vpop.xlane.xlu0 %975  ;;  %v1441_v60 = vpop.xlane.xlu1 %1440 }
 0x4de   : > { %v1443_v12 = vsub.f32 %v3510_v52, %v1441_v60  ;;  %v1375_v52 = vmul.f32 1.442695, %v1372_v47 }
 0x4df   : > { %v984_v32 = vmul.f32 1.442695, %v981_v31 }
 0x4e0   : > { %v1446_v46 = vmul.f32 1.442695, %v1443_v12 }
 0x4e1   : > { %2738 = vpow2.f32 %v984_v32 }
 0x4e2   : > { %1140 = vrot.lane.b32.xlu1 %v3402_v41, %s3113_s27  ;;  %2740 = vpow2.f32 %v1231_v58 }
 0x4e4   : > { %v999_v36 = vpop.permute.xlu2 %998 }
 0x4e5   : > { %1011 = vmatpush.bf16.msrb.mxu3 %v999_v36  ;;  %1069 = vrot.lane.b32.xlu0 %v3402_v41, %s3114_s2  ;;  %v980_v41 = vsub.f32 %v3507_v50, %v976_v37 }
 0x4e7   : > { %v3553_v40 = vpop.eup %2738  ;;  %v982_v57 = vmul.f32 1.442695, %v980_v41 }
 0x4e8   : > { %v989_v43 = vsel %vm903_vm14, %v3553_v40, 0.0  ;;  %v3569_v62 = vpop.eup %2740 }
 0x4e9   : > { %990 = vadd.xlane.f32.xlu2 %v989_v43  ;;  %2742 = vpow2.f32 %v982_v57  ;;  %v1235_v63 = vsel %vm903_vm14, %v3569_v62, 0.0 }
 0x4ea   : > { %2744 = vpow2.f32 %v1446_v46 }
 0x4eb   : > { %2746 = vpow2.f32 %v1303_v29 }
 0x4ec   : > { %2748 = vpow2.f32 %v1375_v52 }
 0x4ed   : > { %2750 = vpow2.f32 %v1444_v3 }
 0x4ee   : > { %2752 = vpow2.f32 %v1373_v53 }
 0x4ef   : > { %v3574_v50 = vpop.eup %2742 }
 0x4f0   : > { %v986_v0 = vsel %vm903_vm14, %v3574_v50, 0.0  ;;  %v3581_v2 = vpop.eup %2744 }
 0x4f1   : > { %v3583_v35 = vpop.eup %2746  ;;  %v1451_v51 = vsel %vm903_vm14, %v3581_v2, 0.0 }
 0x4f2   : > { %v1308_v39 = vsel %vm903_vm14, %v3583_v35, 0.0  ;;  %v3590_v8 = vpop.eup %2748 }
 0x4f3   : > { %v3592_v9 = vpop.eup %2750  ;;  %v1380_v10 = vsel %vm903_vm14, %v3590_v8, 0.0 }
 0x4f4   : > { %v1448_v1 = vsel %vm903_vm14, %v3592_v9, 0.0  ;;  %v3598_v27 = vpop.eup %2752 }
 0x4f5   : > { %v1377_v18 = vsel %vm903_vm14, %v3598_v27, 0.0 }
 0x501   : > { %1317 = vrot.lane.b32.xlu2 %v3563_v59, %s3112_s17 }
 0x509   : > { %1459 = vrot.lane.b32.xlu2 %v3563_v59, %s3113_s27 }
 0x50c   : > { %1236 = vadd.xlane.f32.xlu1 %v1235_v63 }
 0x50f   : > { %987 = vadd.xlane.f32.xlu0 %v986_v0 }
 0x514   : > { %1452 = vadd.xlane.f32.xlu1 %v1451_v51 }
 0x517   : > { %1309 = vadd.xlane.f32.xlu0 %v1308_v39 }
 0x51c   : > { %1381 = vadd.xlane.f32.xlu1 %v1380_v10 }
 0x51f   : > { %1449 = vadd.xlane.f32.xlu0 %v1448_v1 }
 0x527   : > { %1378 = vadd.xlane.f32.xlu0 %v1377_v18 }
 0x534   : > { %v1131_v4 = vpop.xlane.xlu1 %1130 }
 0x535   : > { %2754 = vrcp.f32 %v1131_v4 }
 0x53b   : > { %1388 = vrot.lane.b32.xlu0 %v3563_v59, %s3114_s2  ;;  %v2755_v20 = vpop.eup %2754 }
 0x53c   : > { %v1134_v19 = vpop.xlane.xlu0 %1133  ;;  %v1137_v23 = vmul.f32 %v2755_v20, %v3522_v6  ;;  %v1060_v30 = vpop.xlane.xlu1 %1059 }
 0x53d   : > { %2756 = vrcp.f32 %v1134_v19 }
 0x543   : > { %v2757_v22 = vpop.eup %2756 }
 0x544   : > { %v1138_v25 = vmul.f32 %v2757_v22, %v3530_v15  ;;  %v1063_v13 = vpop.xlane.xlu0 %1062  ;;  %v1307_v6 = vpop.xlane.xlu2 %1306 }
 0x545   : > { %2758 = vrcp.f32 %v1063_v13 }
 0x546   : > { %v1139_v28 = vpack.c.bf16 %v1138_v25, %v1137_v23  ;;  %2760 = vrcp.f32 %v1060_v30 }
 0x54b   : > { %v2759_v24 = vpop.eup %2758 }
 0x54c   : > { %v2761_v31 = vpop.eup %2760  ;;  %v1067_v36 = vmul.f32 %v2759_v24, %v3536_v21  ;;  %v1240_v15 = vpop.xlane.xlu2 %1239 }
 0x54d   : > { %v1066_v43 = vmul.f32 %v2761_v31, %v3527_v56  ;;  %2762 = vrcp.f32 %v1240_v15  ;;  %v2515_v31 = vld [vmem:[#allocation9 + $0x30] sm:$0xff] }
 0x54f   : > { %v1068_v45 = vpack.c.bf16 %v1067_v36, %v1066_v43  ;;  %v2514_v36 = vld [vmem:[#allocation9 + $0x28] sm:$0xff] }
 0x553   : > { %v2763_v21 = vpop.eup %2762 }
 0x554   : > { %v1141_v32 = vpop.permute.xlu1 %1140  ;;  %v1244_v56 = vmul.f32 %v2763_v21, %v3545_v14  ;;  %v2512_v21 = vld [vmem:[#allocation9 + $0x18] sm:$0xff] }
 0x555   : > { %1153 = vmatpush.bf16.msra.mxu3 %v1141_v32 }
 0x557   : > { %v1070_v44 = vpop.permute.xlu0 %1069 }
 0x558   : > { %1082 = vmatpush.bf16.msra.mxu1 %v1070_v44  ;;  %v2513_v44 = vld [vmem:[#allocation9 + $0x20] sm:$0xff] }
 0x55b   : > { %2308 = vmatmul.msk.bf16.vlgmr.msra.gmra.mxu1 %vm903_vm14, %v1068_v45 }
 0x55c   : > { %1256 = vmatpush.bf16.msrb.mxu1 %v3563_v59  ;;  %v991_v48 = vpop.xlane.xlu2 %990 }
 0x564   : > { %v1318_v46 = vpop.permute.xlu2 %1317 }
 0x56c   : > { %v1460_v63 = vpop.permute.xlu2 %1459 }
 0x57f   : > { %v1237_v49 = vpop.xlane.xlu1 %1236 }
 0x580   : > { %2764 = vrcp.f32 %v1237_v49 }
 0x581   : > { %2766 = vrcp.f32 %v991_v48 }
 0x582   : > { %v988_v37 = vpop.xlane.xlu0 %987 }
 0x583   : > { %2768 = vrcp.f32 %v988_v37 }
 0x586   : > { %v2765_v54 = vpop.eup %2764 }
 0x587   : > { %v2767_v55 = vpop.eup %2766  ;;  %v1243_v41 = vmul.f32 %v2765_v54, %v3569_v62  ;;  %v1453_v47 = vpop.xlane.xlu1 %1452  ;;  %v2511_v54 = vld [vmem:[#allocation9 + $0x10] sm:$0xff] }
 0x588   : > { %v995_v60 = vmul.f32 %v2767_v55, %v3553_v40  ;;  %v2510_v55 = vld [vmem:[#allocation9 + $0x8] sm:$0xff] }
 0x589   : > { %v2769_v58 = vpop.eup %2768  ;;  %v1245_v59 = vpack.c.bf16 %v1244_v56, %v1243_v41  ;;  %v2509_v56 = vld [vmem:[#allocation9] sm:$0xff] }
 0x58a   : > { %v994_v57 = vmul.f32 %v2769_v58, %v3574_v50  ;;  %v1310_v12 = vpop.xlane.xlu0 %1309 }
 0x58b   : > { %2312 = vmatmul.msk.bf16.vlgmr.msrb.gmra.mxu1 %vm903_vm14, %v1245_v59  ;;  %2770 = vrcp.f32 %v1310_v12 }
 0x58c   : > { %v996_v61 = vpack.c.bf16 %v995_v60, %v994_v57  ;;  %2772 = vrcp.f32 %v1307_v6 }
 0x58e   : > { %2306 = vmatmul.msk.bf16.vlgmr.msrb.gmra.mxu3 %vm903_vm14, %v996_v61 }
 0x58f   : > { %1330 = vmatpush.bf16.msrb.mxu3 %v1318_v46  ;;  %v1382_v40 = vpop.xlane.xlu1 %1381 }
 0x591   : > { %v2771_v62 = vpop.eup %2770 }
 0x592   : > { %v1450_v29 = vpop.xlane.xlu0 %1449  ;;  %v2773_v50 = vpop.eup %2772  ;;  %v1314_v52 = vmul.f32 %v2771_v62, %v3583_v35 }
 0x593   : > { %v1313_v3 = vmul.f32 %v2773_v50, %v3539_v11 }
 0x595   : > { %v1315_v7 = vpack.c.bf16 %v1314_v52, %v1313_v3 }
 0x59a   : > { %v1379_v14 = vpop.xlane.xlu0 %1378 }
 0x59b   : > { %2774 = vrcp.f32 %v1379_v14 }
 0x59c   : > { %2776 = vrcp.f32 %v1382_v40 }
 0x59d   : > { %2778 = vrcp.f32 %v1450_v29 }
 0x59e   : > { %2310 = vmatmul.msk.bf16.vlgmr.msra.gmra.mxu3 %vm903_vm14, %v1139_v28  ;;  %2780 = vrcp.f32 %v1453_v47 }
 0x59f   : > { %1472 = vmatpush.bf16.msra.mxu3 %v1460_v63 }
 0x5a1   : > { %v2775_v26 = vpop.eup %2774 }
 0x5a2   : > { %v2777_v0 = vpop.eup %2776  ;;  %v1385_v51 = vmul.f32 %v2775_v26, %v3598_v27 }
 0x5a3   : > { %v1386_v39 = vmul.f32 %v2777_v0, %v3590_v8  ;;  %v2779_v1 = vpop.eup %2778 }
 0x5a4   : > { %v2781_v18 = vpop.eup %2780  ;;  %v1456_v35 = vmul.f32 %v2779_v1, %v3592_v9 }
 0x5a5   : > { %v1387_v10 = vpack.c.bf16 %v1386_v39, %v1385_v51  ;;  %v1457_v11 = vmul.f32 %v2781_v18, %v3581_v2  ;;  %v2516_v2 = vld [vmem:[#allocation9 + $0x38] sm:$0xff] }
 0x5a6   : > { %1576 = vmatpush.bf16.msrb.mxu0 %v2516_v2 }
 0x5a7   : > { %v1458_v4 = vpack.c.bf16 %v1457_v11, %v1456_v35 }
 0x5aa   : > { %1577 = vmatpush.bf16.msrb.mxu0 %v2515_v31 }
 0x5ad   : > { %v1389_v53 = vpop.permute.xlu0 %1388 }
 0x5ae   : > { %2314 = vmatmul.msk.bf16.vlgmr.msrb.gmra.mxu3 %vm903_vm14, %v1315_v7  ;;  %1401 = vmatpush.bf16.msra.mxu1 %v1389_v53 }
 0x5af   : > { %1578 = vmatpush.bf16.msrb.mxu0 %v2514_v36 }
 0x5b1   : > { %2316 = vmatmul.msk.bf16.vlgmr.msra.gmra.mxu1 %vm903_vm14, %v1387_v10 }
 0x5b3   : > { %1579 = vmatpush.bf16.msrb.mxu0 %v2513_v44 }
 0x5b7   : > { %1580 = vmatpush.bf16.msrb.mxu0 %v2512_v21 }
 0x5bb   : > { %1581 = vmatpush.bf16.msrb.mxu0 %v2511_v54 }
 0x5be   : > { %2318 = vmatmul.msk.bf16.vlgmr.msra.gmra.mxu3 %vm903_vm14, %v1458_v4 }
 0x5bf   : > { %1582 = vmatpush.bf16.msrb.mxu0 %v2510_v55 }
 0x5c3   : > { %1583 = vmatpush.bf16.msrb.mxu0 %v2509_v56  ;;  %v2409_v56 = vld [vmem:[#allocation10 + $0x70] sm:$0xf] }
 0x5d8   : > { %v1084_v27 = vpop.f32.mrf.mxu1 }
 0x5e0   : > { %v1086_v8 = vpop.f32.mrf.mxu1 }
 0x5e1   : > { %v2673_v19 = vpack.i.bf16 %v1086_v8, %v1084_v27  ;;  %v3646_v8 = vld [vmem:[#allocation13] sm:$0x3f] }
 0x5e3   : > { %2674 = vrot.lane.b32.xlu2 %v2673_v19, %s3114_s2  ;;  %v1527_v19 = vperm.slane %v3646_v8, 4 }
 0x608   : > { %v1258_v25 = vpop.f32.mrf.mxu1 }
 0x610   : > { %v1260_v13 = vpop.f32.mrf.mxu1 }
 0x611   : > { %v1013_v20 = vpop.f32.mrf.mxu3 }
 0x619   : > { %v1015_v22 = vpop.f32.mrf.mxu3 }
 0x61a   : > { %v2668_v23 = vpack.i.bf16 %v1015_v22, %v1013_v20 }
 0x61c   : > { %2669 = vrot.lane.b32.xlu1 %v2668_v23, %s3113_s27 }
 0x621   : > { %v1155_v28 = vpop.f32.mrf.mxu3 }
 0x629   : > { %v1157_v30 = vpop.f32.mrf.mxu3 }
 0x62a   : > { %v2678_v9 = vpack.i.bf16 %v1157_v30, %v1155_v28 }
 0x62c   : > { %2679 = vrot.lane.b32.xlu2 %v2678_v9, %s3112_s17 }
 0x62e   : > { %v1403_v24 = vpop.f32.mrf.mxu1 }
 0x631   : > { %v1332_v32 = vpop.f32.mrf.mxu3 }
 0x636   : > { %v1405_v43 = vpop.f32.mrf.mxu1 }
 0x637   : > { %v2688_v45 = vpack.i.bf16 %v1405_v43, %v1403_v24 }
 0x639   : > { %v1334_v6 = vpop.f32.mrf.mxu3  ;;  %2689 = vrot.lane.b32.xlu2 %v2688_v45, %s3114_s2 }
 0x63a   : > { %v2683_v15 = vpack.i.bf16 %v1334_v6, %v1332_v32 }
 0x63c   : > { %2684 = vrot.lane.b32.xlu0 %v2683_v15, %s3113_s27 }
 0x63d   : > { %v2675_v41 = vpop.permute.xlu2 %2674 }
 0x63e   : > { %v2677_v12 = vunpack.i.h.bf16 %v2675_v41  ;;  %v2676_v61 = vunpack.i.l.bf16 %v2675_v41  ;;  %v2532_v41 = vld [vmem:[#allocation10 + $0x74] sm:$0xf0] }
 0x641   : > { %v1474_v48 = vpop.f32.mrf.mxu3 }
 0x649   : > { %v1476_v49 = vpop.f32.mrf.mxu3 }
 0x64a   : > { %v2693_v37 = vpack.i.bf16 %v1476_v49, %v1474_v48 }
 0x64c   : > { %2694 = vrot.lane.b32.xlu1 %v2693_v37, %s3112_s17 }
 0x686   : > { %v2680_v58 = vpop.permute.xlu2 %2679 }
 0x687   : > { %v2682_v46 = vunpack.i.h.bf16 %v2680_v58  ;;  %v2681_v29 = vunpack.i.l.bf16 %v2680_v58  ;;  %v2531_v58 = vld [vmem:[#allocation10 + $0x74] sm:$0xf] }
 0x68e   : > { %v2670_v59 = vpop.permute.xlu1 %2669 }
 0x68f   : > { %v2672_v60 = vunpack.i.h.bf16 %v2670_v59  ;;  %v2671_v57 = vunpack.i.l.bf16 %v2670_v59  ;;  %v2410_v59 = vor.u32 %v2532_v41, %v2409_v56 }
 0x691   : > { %v1185_v47 = vsel %vm877_vm11, %v3474_v5, %v2672_v60  ;;  %v1184_v63 = vsel %vm877_vm11, %v3455_v42, %v2671_v57  ;;  %v2411_v60 = vld [vmem:[#allocation10 + $0x78] sm:$0xf0]  ;;  %1805 = vmatpush.bf16.msrb.mxu1 %v2410_v59 }
 0x692   : > { %v1188_v14 = vsel %vm1186_vm0, %v1185_v47, %v2677_v12  ;;  %v1187_v40 = vsel %vm1186_vm0, %v1184_v63, %v2676_v61  ;;  %v2414_v57 = vor.u32 %v2531_v58, %v2411_v60  ;;  %v2401_v12 = vld [vmem:[#allocation10 + $0x60] sm:$0xf]  ;;  %v2530_v61 = vld [vmem:[#allocation10 + $0x64] sm:$0xf0]  ;;  %v2393_v63 = vld [vmem:[#allocation10 + $0x50] sm:$0xf] }
 0x693   : > { %v1190_v62 = vsel %vm1189_vm1, %v1187_v40, %v2681_v29  ;;  %v1191_v50 = vsel %vm1189_vm1, %v1188_v14, %v2682_v46  ;;  %v2690_v51 = vpop.permute.xlu2 %2689  ;;  %v2529_v46 = vld [vmem:[#allocation10 + $0x64] sm:$0xf]  ;;  %v2402_v29 = vor.u32 %v2530_v61, %v2401_v12  ;;  %v2528_v14 = vld [vmem:[#allocation10 + $0x54] sm:$0xf0]  ;;  %v2527_v40 = vld [vmem:[#allocation10 + $0x54] sm:$0xf] }
 0x694   : > { %v1509_v26 = vpack.c.bf16 %v1191_v50, %v1190_v62  ;;  %v2692_v39 = vunpack.i.h.bf16 %v2690_v51  ;;  %v2691_v42 = vunpack.i.l.bf16 %v2690_v51  ;;  %1824 = vmatpush.bf16.msra.mxu2 %v2414_v57  ;;  %v2394_v62 = vor.u32 %v2528_v14, %v2393_v63  ;;  %v2395_v50 = vld [vmem:[#allocation10 + $0x58] sm:$0xf0] }
 0x695   : > { %1806 = vmatpush.bf16.msrb.mxu1 %v2402_v29 }
 0x696   : > { %1584 = vmatmul.bf16.vlgmr.msrb.gmra.mxu0 %v1509_v26  ;;  %v2398_v26 = vor.u32 %v2527_v40, %v2395_v50 }
 0x699   : > { %1807 = vmatpush.bf16.msrb.mxu1 %v2394_v62 }
 0x6ae   : > { %v2685_v52 = vpop.permute.xlu0 %2684 }
 0x6af   : > { %v2687_v0 = vunpack.i.h.bf16 %v2685_v52  ;;  %v2686_v3 = vunpack.i.l.bf16 %v2685_v52  ;;  %v2385_v52 = vld [vmem:[#allocation10 + $0x40] sm:$0xf] }
 0x6b1   : > { %v1504_v7 = vsel %vm877_vm11, %v1260_v13, %v2687_v0  ;;  %v1503_v5 = vsel %vm877_vm11, %v1258_v25, %v2686_v3  ;;  %v2526_v0 = vld [vmem:[#allocation10 + $0x44] sm:$0xf0]  ;;  %v2525_v3 = vld [vmem:[#allocation10 + $0x44] sm:$0xf] }
 0x6b2   : > { %v1505_v18 = vsel %vm1186_vm0, %v1503_v5, %v2691_v42  ;;  %v1506_v35 = vsel %vm1186_vm0, %v1504_v7, %v2692_v39  ;;  %v2386_v51 = vor.u32 %v2526_v0, %v2385_v52  ;;  %v2387_v7 = vld [vmem:[#allocation10 + $0x48] sm:$0xf0]  ;;  %v2377_v5 = vld [vmem:[#allocation10 + $0x30] sm:$0xf]  ;;  %v2524_v39 = vld [vmem:[#allocation10 + $0x34] sm:$0xf0] }
 0x6b3   : > { %v2390_v42 = vor.u32 %v2525_v3, %v2387_v7 }
 0x6b4   : > { %1808 = vmatpush.bf16.msrb.mxu1 %v2386_v51  ;;  %v3691_v51 = vperm.slane %v3646_v8, 2 }
 0x6be   : > { %v2695_v53 = vpop.permute.xlu1 %2694 }
 0x6bf   : > { %v2697_v10 = vunpack.i.h.bf16 %v2695_v53  ;;  %v2696_v1 = vunpack.i.l.bf16 %v2695_v53  ;;  %v2523_v53 = vld [vmem:[#allocation10 + $0x34] sm:$0xf] }
 0x6c1   : > { %v1507_v11 = vsel %vm1189_vm1, %v1505_v18, %v2696_v1  ;;  %v1508_v4 = vsel %vm1189_vm1, %v1506_v35, %v2697_v10  ;;  %v2379_v10 = vld [vmem:[#allocation10 + $0x38] sm:$0xf0]  ;;  %v2378_v18 = vor.u32 %v2524_v39, %v2377_v5 }
 0x6c2   : > { %v1510_v27 = vpack.c.bf16 %v1508_v4, %v1507_v11  ;;  %v2382_v11 = vor.u32 %v2523_v53, %v2379_v10  ;;  %v2369_v4 = vld [vmem:[#allocation10 + $0x20] sm:$0xf] }
 0x6c3   : > { %1809 = vmatpush.bf16.msrb.mxu1 %v2378_v18 }
 0x6c4   : > { %1589 = vmatmul.bf16.gmra.mxu0 %v1510_v27  ;;  %v2522_v27 = vld [vmem:[#allocation10 + $0x24] sm:$0xf0] }
 0x713   : > { %v1585_v20 = vpop.f32.mrf.mxu0 }
 0x714   : > { %v1586_v22 = vadd.f32 %v1585_v20, %v1527_v19  ;;  %v2371_v20 = vld [vmem:[#allocation10 + $0x28] sm:$0xf0] }
 0x716   : > { %v3650_v23 = vadd.f32 %v1586_v22, %v3339_v16  ;;  %v2370_v22 = vor.u32 %v2522_v27, %v2369_v4 }
 0x718   : > { %1599 = vadd.xlane.f32.xlu0 %v3650_v23  ;;  %1810 = vmatpush.bf16.msrb.mxu1 %v2370_v22 }
 0x71b   : > { %v1587_v25 = vpop.f32.mrf.mxu0 }
 0x71c   : > { %v1588_v28 = vadd.f32 %v1587_v25, %v1527_v19 }
 0x71e   : > { %v3654_v13 = vadd.f32 %v1588_v28, %v3343_v17  ;;  %v2361_v28 = vld [vmem:[#allocation10 + $0x10] sm:$0xf] }
 0x720   : > { %1601 = vadd.xlane.f32.xlu2 %v3654_v13 }
 0x741   : > { %v1590_v30 = vpop.f32.mrf.mxu0 }
 0x742   : > { %v1591_v9 = vadd.f32 %v1590_v30, %v1527_v19  ;;  %v2520_v30 = vld [vmem:[#allocation10 + $0x14] sm:$0xf0] }
 0x744   : > { %v3658_v2 = vadd.f32 %v1591_v9, %v3350_v34  ;;  %v2519_v9 = vld [vmem:[#allocation10 + $0x14] sm:$0xf] }
 0x746   : > { %1603 = vadd.xlane.f32.xlu1 %v3658_v2 }
 0x749   : > { %v1592_v24 = vpop.f32.mrf.mxu0 }
 0x74a   : > { %v1593_v31 = vadd.f32 %v1592_v24, %v1527_v19  ;;  %v2521_v19 = vld [vmem:[#allocation10 + $0x24] sm:$0xf]  ;;  %v2363_v24 = vld [vmem:[#allocation10 + $0x18] sm:$0xf0] }
 0x74b   : > { %v2374_v25 = vor.u32 %v2521_v19, %v2371_v20 }
 0x74c   : > { %v3662_v16 = vadd.f32 %v1593_v31, %v3358_v38 }
 0x74e   : > { %1605 = vadd.xlane.f32.xlu0 %v3662_v16 }
 0x78b   : > { %v1600_v32 = vpop.xlane.xlu0 %1599 }
 0x78c   : > { %v1607_v17 = vmul.f32 %v1600_v32, %v3347_v33  ;;  %v2362_v32 = vor.u32 %v2520_v30, %v2361_v28  ;;  %v2540_v28 = vld [vmem:[#allocation12 + $0x38] sm:$0xff] }
 0x78d   : > { %v2548_v30 = vld [vmem:[#allocation12 + $0x78] sm:$0xff]  ;;  %1984 = vmatpush.bf16.msrb.mxu3 %v2540_v28 }
 0x78e   : > { %v3667_v36 = vsub.f32 %v3650_v23, %v1607_v17  ;;  %1811 = vmatpush.bf16.msrb.mxu1 %v2362_v32  ;;  %2003 = vmatpush.bf16.msra.mxu0 %v2548_v30  ;;  %v2547_v32 = vld [vmem:[#allocation12 + $0x70] sm:$0xff] }
 0x790   : > { %v1615_v43 = vmul.f32 %v3667_v36, %v3667_v36 }
 0x792   : > { %1619 = vadd.xlane.f32.xlu2 %v1615_v43  ;;  %2004 = vmatpush.bf16.msra.mxu0 %v2547_v32 }
 0x793   : > { %v1602_v34 = vpop.xlane.xlu2 %1601 }
 0x794   : > { %v1608_v44 = vmul.f32 %v1602_v34, %v3347_v33  ;;  %v2366_v34 = vor.u32 %v2519_v9, %v2363_v24 }
 0x796   : > { %v3673_v45 = vsub.f32 %v3654_v13, %v1608_v44  ;;  %v2353_v44 = vld [vmem:[#allocation10] sm:$0xf] }
 0x798   : > { %v1616_v38 = vmul.f32 %v3673_v45, %v3673_v45 }
 0x79a   : > { %1621 = vadd.xlane.f32.xlu1 %v1616_v38  ;;  %v2518_v38 = vld [vmem:[#allocation10 + $0x4] sm:$0xf0] }
 0x7b9   : > { %v1604_v6 = vpop.xlane.xlu1 %1603 }
 0x7ba   : > { %v1609_v15 = vmul.f32 %v1604_v6, %v3347_v33 }
 0x7bc   : > { %v3679_v48 = vsub.f32 %v3658_v2, %v1609_v15  ;;  %v2517_v15 = vld [vmem:[#allocation10 + $0x4] sm:$0xf] }
 0x7be   : > { %v1617_v49 = vmul.f32 %v3679_v48, %v3679_v48 }
 0x7c0   : > { %1623 = vadd.xlane.f32.xlu0 %v1617_v49  ;;  %v2355_v49 = vld [vmem:[#allocation10 + $0x8] sm:$0xf0] }
 0x7c1   : > { %v1606_v37 = vpop.xlane.xlu0 %1605 }
 0x7c2   : > { %v1610_v21 = vmul.f32 %v1606_v37, %v3347_v33  ;;  %v2403_v33 = vld [vmem:[#allocation10 + $0x68] sm:$0xf0] }
 0x7c3   : > { %v2406_v47 = vor.u32 %v2529_v46, %v2403_v33 }
 0x7c4   : > { %v3685_v54 = vsub.f32 %v3662_v16, %v1610_v21  ;;  %v2354_v21 = vor.u32 %v2518_v38, %v2353_v44 }
 0x7c5   : > { %1825 = vmatpush.bf16.msra.mxu2 %v2406_v47 }
 0x7c6   : > { %v1618_v55 = vmul.f32 %v3685_v54, %v3685_v54  ;;  %1812 = vmatpush.bf16.msrb.mxu1 %v2354_v21 }
 0x7c8   : > { %1625 = vadd.xlane.f32.xlu2 %v1618_v55  ;;  %v2358_v55 = vor.u32 %v2517_v15, %v2355_v49  ;;  %v2538_v15 = vld [vmem:[#allocation12 + $0x28] sm:$0xff] }
 0x7c9   : > { %1826 = vmatpush.bf16.msra.mxu2 %v2398_v26  ;;  %v2546_v49 = vld [vmem:[#allocation12 + $0x68] sm:$0xff] }
 0x7ca   : > { %2005 = vmatpush.bf16.msra.mxu0 %v2546_v49  ;;  %v1887_v49 = vperm.slane %v3646_v8, 5 }
 0x7cd   : > { %1827 = vmatpush.bf16.msra.mxu2 %v2390_v42  ;;  %v1696_v42 = vperm.slane %v3646_v8, 3 }
 0x7d1   : > { %1828 = vmatpush.bf16.msra.mxu2 %v2382_v11 }
 0x7d5   : > { %1829 = vmatpush.bf16.msra.mxu2 %v2374_v25 }
 0x7d9   : > { %1830 = vmatpush.bf16.msra.mxu2 %v2366_v34 }
 0x7dd   : > { %1831 = vmatpush.bf16.msra.mxu2 %v2358_v55 }
 0x805   : > { %v1620_v1 = vpop.xlane.xlu2 %1619 }
 0x806   : > { %v1627_v35 = vmul.f32 0.007874016, %v1620_v1 }
 0x808   : > { %2782 = vrsqrt.f32 %v1627_v35  ;;  %vm1638_vm2 = vcmp.eq.f32.partialorder %v1627_v35, inf  ;;  %v1641_v61 = vand.u32 2147483648, %v1627_v35  ;;  %vm1640_vm3 = vcmp.eq.f32.partialorder %v1627_v35, 0.0 }
 0x80d   : > { %v1622_v31 = vpop.xlane.xlu1 %1621 }
 0x80e   : > { %v2783_v17 = vpop.eup %2782  ;;  %v1628_v43 = vmul.f32 0.007874016, %v1622_v31  ;;  %v2539_v31 = vld [vmem:[#allocation12 + $0x30] sm:$0xff] }
 0x80f   : > { %v1632_v6 = vmul.f32 %v2783_v17, %v1627_v35  ;;  %1985 = vmatpush.bf16.msrb.mxu3 %v2539_v31 }
 0x810   : > { %2784 = vrsqrt.f32 %v1628_v43  ;;  %vm1650_vm4 = vcmp.eq.f32.partialorder %v1628_v43, inf  ;;  %v1653_v62 = vand.u32 2147483648, %v1628_v43  ;;  %vm1652_vm5 = vcmp.eq.f32.partialorder %v1628_v43, 0.0 }
 0x811   : > { %v1633_v37 = vmul.f32 %v2783_v17, %v1632_v6 }
 0x813   : > { %v1634_v56 = vmul.f32 0.5, %v1633_v37  ;;  %1986 = vmatpush.bf16.msrb.mxu3 %v2538_v15 }
 0x815   : > { %v1635_v41 = vsub.f32 1.5, %v1634_v56  ;;  %v2537_v56 = vld [vmem:[#allocation12 + $0x20] sm:$0xff] }
 0x816   : > { %v2785_v58 = vpop.eup %2784 }
 0x817   : > { %v1636_v59 = vmul.f32 %v2783_v17, %v1635_v41  ;;  %v1644_v60 = vmul.f32 %v2785_v58, %v1628_v43  ;;  %1987 = vmatpush.bf16.msrb.mxu3 %v2537_v56 }
 0x819   : > { %v1637_v57 = vmul.f32 %v1636_v59, %v1627_v35  ;;  %v1645_v12 = vmul.f32 %v2785_v58, %v1644_v60 }
 0x81b   : > { %v1646_v46 = vmul.f32 0.5, %v1645_v12  ;;  %v1639_v29 = vsel %vm1638_vm2, %v1627_v35, %v1637_v57 }
 0x81c   : > { %v1642_v33 = vsel %vm1640_vm3, %v1641_v61, %v1639_v29 }
 0x81d   : > { %v1647_v47 = vsub.f32 1.5, %v1646_v46  ;;  %v1679_v63 = vadd.f32 1e-06, %v1642_v33 }
 0x81f   : > { %v1648_v14 = vmul.f32 %v2785_v58, %v1647_v47  ;;  %2786 = vrcp.f32 %v1679_v63 }
 0x821   : > { %v1649_v40 = vmul.f32 %v1648_v14, %v1628_v43 }
 0x823   : > { %v1651_v50 = vsel %vm1650_vm4, %v1628_v43, %v1649_v40 }
 0x824   : > { %v1654_v26 = vsel %vm1652_vm5, %v1653_v62, %v1651_v50  ;;  %v2536_v62 = vld [vmem:[#allocation12 + $0x18] sm:$0xff]  ;;  %v2545_v50 = vld [vmem:[#allocation12 + $0x60] sm:$0xff] }
 0x825   : > { %v1680_v52 = vadd.f32 1e-06, %v1654_v26  ;;  %v2787_v0 = vpop.eup %2786  ;;  %1988 = vmatpush.bf16.msrb.mxu3 %v2536_v62  ;;  %v2535_v26 = vld [vmem:[#allocation12 + $0x10] sm:$0xff]  ;;  %2006 = vmatpush.bf16.msra.mxu0 %v2545_v50 }
 0x826   : > { %v1687_v3 = vmul.f32 %v2787_v0, %v3667_v36  ;;  %v2533_v0 = vld [vmem:[#allocation12] sm:$0xff] }
 0x827   : > { %2788 = vrcp.f32 %v1680_v52  ;;  %v2544_v52 = vld [vmem:[#allocation12 + $0x58] sm:$0xff] }
 0x828   : > { %v1692_v39 = vmul.f32 %v3691_v51, %v1687_v3  ;;  %v2542_v3 = vld [vmem:[#allocation12 + $0x48] sm:$0xff] }
 0x829   : > { %1989 = vmatpush.bf16.msrb.mxu3 %v2535_v26  ;;  %2007 = vmatpush.bf16.msra.mxu0 %v2544_v52 }
 0x82a   : > { %v1697_v10 = vadd.f32 %v1696_v42, %v1692_v39 }
 0x82d   : > { %v2789_v7 = vpop.eup %2788 }
 0x82e   : > { %v1688_v5 = vmul.f32 %v2789_v7, %v3673_v45  ;;  %v1719_v7 = vld [vmem:[%s3732_s6] sm:$0x3] }
 0x82f   : > { %v1721_v39 = vperm.slane %v1719_v7, 0 }
 0x830   : > { %v1693_v53 = vmul.f32 %v3691_v51, %v1688_v5 }
 0x832   : > { %v1698_v1 = vadd.f32 %v1696_v42, %v1693_v53 }
 0x833   : > { %v1624_v18 = vpop.xlane.xlu0 %1623 }
 0x834   : > { %v1629_v35 = vmul.f32 0.007874016, %v1624_v18  ;;  %v1701_v11 = vpack.c.bf16 %v1698_v1, %v1697_v10  ;;  %v1722_v1 = vperm.slane %v1719_v7, 1 }
 0x836   : > { %2790 = vrsqrt.f32 %v1629_v35  ;;  %1813 = vmatmul.bf16.vlgmr.msrb.gmra.mxu1 %v1701_v11  ;;  %1832 = vmatmul.bf16.vlgmr.msra.gmra.mxu2 %v1701_v11  ;;  %vm1662_vm6 = vcmp.eq.f32.partialorder %v1629_v35, inf  ;;  %v1665_v34 = vand.u32 2147483648, %v1629_v35  ;;  %vm1664_vm7 = vcmp.eq.f32.partialorder %v1629_v35, 0.0 }
 0x83b   : > { %v1626_v36 = vpop.xlane.xlu2 %1625 }
 0x83c   : > { %v2791_v4 = vpop.eup %2790  ;;  %v1630_v27 = vmul.f32 0.007874016, %v1626_v36 }
 0x83d   : > { %v1656_v19 = vmul.f32 %v2791_v4, %v1629_v35 }
 0x83e   : > { %2792 = vrsqrt.f32 %v1630_v27  ;;  %vm1674_vm8 = vcmp.eq.f32.partialorder %v1630_v27, inf  ;;  %v1677_v58 = vand.u32 2147483648, %v1630_v27  ;;  %vm1676_vm9 = vcmp.eq.f32.partialorder %v1630_v27, 0.0 }
 0x83f   : > { %v1657_v45 = vmul.f32 %v2791_v4, %v1656_v19 }
 0x841   : > { %v1658_v20 = vmul.f32 0.5, %v1657_v45 }
 0x843   : > { %v1659_v22 = vsub.f32 1.5, %v1658_v20 }
 0x844   : > { %v2793_v25 = vpop.eup %2792 }
 0x845   : > { %v1668_v9 = vmul.f32 %v2793_v25, %v1630_v27  ;;  %v1660_v24 = vmul.f32 %v2791_v4, %v1659_v22 }
 0x847   : > { %v1669_v17 = vmul.f32 %v2793_v25, %v1668_v9  ;;  %v1661_v43 = vmul.f32 %v1660_v24, %v1629_v35 }
 0x849   : > { %v1663_v44 = vsel %vm1662_vm6, %v1629_v35, %v1661_v43  ;;  %v1670_v38 = vmul.f32 0.5, %v1669_v17 }
 0x84a   : > { %v1666_v6 = vsel %vm1664_vm7, %v1665_v34, %v1663_v44 }
 0x84b   : > { %v1671_v37 = vsub.f32 1.5, %v1670_v38  ;;  %v1681_v21 = vadd.f32 1e-06, %v1666_v6 }
 0x84d   : > { %v1672_v55 = vmul.f32 %v2793_v25, %v1671_v37  ;;  %2794 = vrcp.f32 %v1681_v21 }
 0x84f   : > { %v1673_v41 = vmul.f32 %v1672_v55, %v1630_v27 }
 0x851   : > { %v1675_v59 = vsel %vm1674_vm8, %v1630_v27, %v1673_v41 }
 0x852   : > { %v1678_v60 = vsel %vm1676_vm9, %v1677_v58, %v1675_v59 }
 0x853   : > { %v1682_v57 = vadd.f32 1e-06, %v1678_v60  ;;  %v2795_v12 = vpop.eup %2794 }
 0x854   : > { %v1689_v61 = vmul.f32 %v2795_v12, %v3679_v48  ;;  %v2534_v48 = vld [vmem:[#allocation12 + $0x8] sm:$0xff] }
 0x855   : > { %2796 = vrcp.f32 %v1682_v57  ;;  %1990 = vmatpush.bf16.msrb.mxu3 %v2534_v48 }
 0x856   : > { %v1694_v33 = vmul.f32 %v3691_v51, %v1689_v61 }
 0x858   : > { %v1699_v63 = vadd.f32 %v1696_v42, %v1694_v33 }
 0x859   : > { %1991 = vmatpush.bf16.msrb.mxu3 %v2533_v0 }
 0x85b   : > { %v2797_v46 = vpop.eup %2796 }
 0x85c   : > { %v1690_v29 = vmul.f32 %v2797_v46, %v3685_v54  ;;  %v2543_v54 = vld [vmem:[#allocation12 + $0x50] sm:$0xff] }
 0x85d   : > { %2008 = vmatpush.bf16.msra.mxu0 %v2543_v54 }
 0x85e   : > { %v1695_v47 = vmul.f32 %v3691_v51, %v1690_v29  ;;  %v2541_v51 = vld [vmem:[#allocation12 + $0x40] sm:$0xff] }
 0x860   : > { %v1700_v14 = vadd.f32 %v1696_v42, %v1695_v47 }
 0x861   : > { %2009 = vmatpush.bf16.msra.mxu0 %v2542_v3 }
 0x862   : > { %v1702_v40 = vpack.c.bf16 %v1700_v14, %v1699_v63 }
 0x864   : > { %1818 = vmatmul.bf16.gmra.mxu1 %v1702_v40  ;;  %1837 = vmatmul.bf16.gmra.mxu2 %v1702_v40 }
 0x865   : > { %2010 = vmatpush.bf16.msra.mxu0 %v2541_v51 }
 0x8b3   : > { %v1814_v5 = vpop.f32.mrf.mxu1 }
 0x8b4   : > { %v1815_v53 = vadd.f32 %v1814_v5, %v1721_v39 }
 0x8b6   : > { %v1843_v35 = vmax.f32 %v1815_v53, 0.0 }
 0x8b9   : > { %v1833_v42 = vpop.f32.mrf.mxu2 }
 0x8ba   : > { %v1834_v36 = vadd.f32 %v1833_v42, %v1722_v1 }
 0x8bb   : > { %v1816_v10 = vpop.f32.mrf.mxu1 }
 0x8bc   : > { %v1817_v18 = vadd.f32 %v1816_v10, %v1721_v39  ;;  %v1844_v45 = vmax.f32 %v1834_v36, 0.0 }
 0x8be   : > { %v1845_v11 = vmax.f32 %v1817_v18, 0.0 }
 0x8c0   : > { %v1851_v4 = vpack.c.bf16 %v1845_v11, %v1843_v35 }
 0x8c1   : > { %v1835_v27 = vpop.f32.mrf.mxu2 }
 0x8c2   : > { %v1836_v19 = vadd.f32 %v1835_v27, %v1722_v1  ;;  %1992 = vmatmul.bf16.vlgmr.msrb.gmra.mxu3 %v1851_v4 }
 0x8c4   : > { %v1846_v20 = vmax.f32 %v1836_v19, 0.0 }
 0x8c6   : > { %v1852_v22 = vpack.c.bf16 %v1846_v20, %v1844_v45 }
 0x8c8   : > { %2011 = vmatmul.bf16.vlgmr.msra.gmra.mxu0 %v1852_v22 }
 0x8e1   : > { %v1819_v25 = vpop.f32.mrf.mxu1 }
 0x8e2   : > { %v1820_v30 = vadd.f32 %v1819_v25, %v1721_v39 }
 0x8e4   : > { %v1847_v31 = vmax.f32 %v1820_v30, 0.0 }
 0x8e7   : > { %v1838_v28 = vpop.f32.mrf.mxu2 }
 0x8e8   : > { %v1839_v17 = vadd.f32 %v1838_v28, %v1722_v1 }
 0x8e9   : > { %v1821_v9 = vpop.f32.mrf.mxu1 }
 0x8ea   : > { %v1822_v24 = vadd.f32 %v1821_v9, %v1721_v39  ;;  %v1848_v38 = vmax.f32 %v1839_v17, 0.0 }
 0x8ec   : > { %v1849_v32 = vmax.f32 %v1822_v24, 0.0 }
 0x8ee   : > { %v1853_v43 = vpack.c.bf16 %v1849_v32, %v1847_v31 }
 0x8ef   : > { %v1840_v34 = vpop.f32.mrf.mxu2 }
 0x8f0   : > { %v1841_v44 = vadd.f32 %v1840_v34, %v1722_v1  ;;  %1997 = vmatmul.bf16.gmra.mxu3 %v1853_v43 }
 0x8f2   : > { %v1850_v6 = vmax.f32 %v1841_v44, 0.0 }
 0x8f4   : > { %v1854_v15 = vpack.c.bf16 %v1850_v6, %v1848_v38 }
 0x8f6   : > { %2016 = vmatmul.bf16.gmra.mxu0 %v1854_v15 }
 0x945   : > { %v1993_v37 = vpop.f32.mrf.mxu3  ;;  %v2012_v21 = vpop.f32.mrf.mxu0 }
 0x946   : > { %v1994_v55 = vadd.f32 %v1993_v37, %v1887_v49 }
 0x948   : > { %v2013_v56 = vadd.f32 %v2012_v21, %v1994_v55 }
 0x94a   : > { %v2022_v41 = vadd.f32 %v2013_v56, %v3650_v23 }
 0x94c   : > { %2026 = vst [vmem:[%s494_s20] sm:$0xff] %v2022_v41 }
 0x94d   : > { %v1995_v58 = vpop.f32.mrf.mxu3  ;;  %v2014_v60 = vpop.f32.mrf.mxu0 }
 0x94e   : > { %v1996_v59 = vadd.f32 %v1995_v58, %v1887_v49 }
 0x950   : > { %v2015_v57 = vadd.f32 %v2014_v60, %v1996_v59 }
 0x952   : > { %v2023_v12 = vadd.f32 %v2015_v57, %v3654_v13 }
 0x954   : > { %2027 = vst [vmem:[%s494_s20 + $0x8] sm:$0x1] %v2023_v12 }
 0x973   : > { %v1998_v8 = vpop.f32.mrf.mxu3  ;;  %v2017_v61 = vpop.f32.mrf.mxu0 }
 0x974   : > { %v1999_v46 = vadd.f32 %v1998_v8, %v1887_v49 }
 0x976   : > { %v2018_v29 = vadd.f32 %v2017_v61, %v1999_v46 }
 0x978   : > { %v2024_v33 = vadd.f32 %v2018_v29, %v3658_v2 }
 0x97a   : > { %2479 = vst [vmem:[%s494_s20 + $0x10] sm:$0xff] %v2024_v33 }
 0x97b   : > { %v2000_v47 = vpop.f32.mrf.mxu3  ;;  %v2019_v14 = vpop.f32.mrf.mxu0 }
 0x97c   : > { %v2001_v63 = vadd.f32 %v2000_v47, %v1887_v49 }
 0x97e   : > { %v2020_v40 = vadd.f32 %v2019_v14, %v2001_v63 }
 0x980   : > { %v2025_v23 = vadd.f32 %v2020_v40, %v3662_v16 }
 0x982   : > { %2480 = vst [vmem:[%s494_s20 + $0x18] sm:$0x1] %v2025_v23 }
 0x983 PF: > { %p25_p3 = scmp.ge.s32.totalorder %s3237_s19, 4   ;;  %s3754_s30 = smov %s3085_s10 }
 0x984   : > { %s3755_s10 = smov %s3089_s11  ;;  %s3756_s11 = smov %s3249_s22 }
 0x985   : > { %s3757_s12 = smov %s3237_s19  ;;  %27 = sbr.rel (!%p25_p3) target bundleno = 14 (0xe), region = 134 }
 0x98a   :  { %2055 = vsyncpa [#allocation3], 1 }
 0x98b   :  { %2057 = vsyncpa [#allocation3 + $0x1], 1 }
 0x98c   :  { %2058 = vsyncpa [#allocation5], 1 }
 0x98d   :  { %2060 = vsyncpa [#allocation5 + $0x1], 1 }
 0x98e   :  { %2061 = vsyncpa [#allocation8], 1 }
 0x98f   :  { %2062 = vsyncpa [#allocation11], 1 }
 0x990   :  { %2063 = vsyncpa [#allocation14], 1 }

</bundles_post_ra>
